<compile_context>
chip_gen: v7x
topology: tpu7x:2x2x1
jax: 0.10.0
libtpu: 0.0.40
codegen_flags: <defaults>
</compile_context>

<pallas_src>
import jax
import jax.numpy as jnp
from jax import lax
from jax.experimental import pallas as pl
from jax.experimental.pallas import tpu as pltpu

HIDDEN = 32            # LSTM hidden size
GATES = 4 * HIDDEN     # 128; PyTorch gate order i, f, g, o
IN_PRE = 2             # pre_proce input features
IN_LSTM = 10           # pre_proce output / LSTM layer-0 input features
PROWS = 120            # parameter-slab rows (multiple of 8)
OUT_LANES = 128        # merged output: feat lanes 0:32, logits lanes 32:34

# Row offsets inside the [PROWS, 256] parameter slab.
_R_WREC = 0     # rows 0:64    [[w_hh0, w_ih1], [0, w_hh1]]      (gate-scaled)
_R_WIH0 = 64    # rows 64:74   w_ih0 [10,128] in cols 0:128      (gate-scaled)
_R_B0 = 74      # row 74       b_ih0 + b_hh0 in cols 0:128       (gate-scaled)
_R_B1 = 75      # row 75       b_ih1 + b_hh1 in cols 0:128       (gate-scaled)
_R_WPRE = 76    # rows 76:78   pre_proce weight [2,10]           (x 0.5)
_R_BPRE = 78    # row 78       pre_proce bias   [10]             (x 0.5)
_R_HEADW = 80   # rows 80:112  fc1 weight cols 0:32, hidden_out weight cols 128:130
_R_HEADB = 112  # row 112      fc1 bias cols 0:32, hidden_out bias cols 128:130


def _kernel(x_ref, p_ref, out_ref):
    f32 = jnp.float32
    H, G = HIDDEN, GATES
    seq = x_ref.shape[0]                    # static

    # ---------------- hoisted work (off the recurrent critical path) -------
    w_pre = p_ref[_R_WPRE:_R_WPRE + IN_PRE, 0:IN_LSTM]            # [2, 10]
    b_pre = p_ref[_R_BPRE:_R_BPRE + 1, 0:IN_LSTM]                 # [1, 10]
    # pre_proce + sigmoid (tanh form; weights/bias pre-scaled by 0.5 on host)
    x10 = 0.5 + 0.5 * jnp.tanh(
        jnp.dot(x_ref[...], w_pre, preferred_element_type=f32) + b_pre)  # [seq,10]

    w_ih0 = p_ref[_R_WIH0:_R_WIH0 + IN_LSTM, 0:G]                 # [10, 128]
    b0 = p_ref[_R_B0:_R_B0 + 1, 0:G]                              # [1, 128]
    b1 = p_ref[_R_B1:_R_B1 + 1, 0:G]                              # [1, 128]
    # Layer-0 input-side gate projections for ALL timesteps in one MXU call.
    g0_in = jnp.dot(x10, w_ih0, preferred_element_type=f32) + b0   # [seq, 128]

    # Per-wavefront-step additive term: [layer-0 input proj | layer-1 bias].
    bias_all = jnp.concatenate(
        [jnp.concatenate([g0_in, jnp.zeros((1, G), f32)], axis=0),
         jnp.broadcast_to(b1, (seq + 1, G))],
        axis=1)                                                    # [seq+1, 256]

    w_rec = p_ref[_R_WREC:_R_WREC + 2 * H, :]                      # [64, 256]

    # Lane mask selecting the "g" (cell-candidate) gate of each layer.
    lane = lax.broadcasted_iota(jnp.int32, (1, 2 * G), 1)
    lane_mod = jnp.bitwise_and(lane, G - 1)
    g_mask = jnp.logical_and(lane_mod >= 2 * H, lane_mod < 3 * H)  # [1, 256]

    # ------------- wavefront recurrence (layer 1 lags layer 0 by 1) --------
    h0 = jnp.zeros((1, H), f32)
    c0 = jnp.zeros((1, H), f32)
    h1 = jnp.zeros((1, H), f32)
    c1 = jnp.zeros((1, H), f32)
    # TODO(synk): for very long sequences switch to lax.fori_loop(unroll=8)
    # and stream g0_in from VMEM to bound vreg pressure (fine at seq=8).
    for s in range(seq + 1):
        hh = jnp.concatenate([h0, h1], axis=1)                     # [1, 64]
        # One matmul covers layer-0 recurrence AND layer-1 input+recurrence.
        g_raw = jnp.dot(hh, w_rec, preferred_element_type=f32)     # [1, 256]
        # One full-width tanh: i/f/o lanes hold tanh(z/2) -> sigmoid(z),
        # g lanes hold tanh(z) (pre-scaled weights).
        th = jnp.tanh(g_raw + bias_all[s:s + 1, :])
        act = jnp.where(g_mask, th, 0.5 + 0.5 * th)                # [1, 256]

        if s < seq:      # layer-0 timestep s
            c0 = act[:, H:2 * H] * c0 + act[:, 0:H] * act[:, 2 * H:3 * H]
        if s >= 1:       # layer-1 timestep s-1
            c1 = act[:, 5 * H:6 * H] * c1 + act[:, 4 * H:5 * H] * act[:, 6 * H:7 * H]
        tc = jnp.tanh(jnp.concatenate([c0, c1], axis=1))           # [1, 64]
        if s < seq:
            h0 = act[:, 3 * H:4 * H] * tc[:, 0:H]
        if s >= 1:
            h1 = act[:, 7 * H:8 * H] * tc[:, H:2 * H]

    # TODO(synk): inter-layer dropout(p=0.5) is identity (eval-mode inference).

    # ---------------- head: relu(fc1(r_out[-1])), hidden_out ---------------
    w_fc1 = p_ref[_R_HEADW:_R_HEADW + H, 0:H]                      # [32, 32]
    w_out = p_ref[_R_HEADW:_R_HEADW + H, G:G + 2]                  # [32, 2]
    b_fc1 = p_ref[_R_HEADB:_R_HEADB + 1, 0:H]                      # [1, 32]
    b_out = p_ref[_R_HEADB:_R_HEADB + 1, G:G + 2]                  # [1, 2]

    feat = jnp.maximum(
        jnp.dot(h1, w_fc1, preferred_element_type=f32) + b_fc1, 0.0)   # [1, 32]
    logits = jnp.dot(feat, w_out, preferred_element_type=f32) + b_out   # [1, 2]

    # Single lane-dense output: feat in lanes 0:32, logits in lanes 32:34.
    out_ref[...] = jnp.concatenate(
        [feat, logits, jnp.zeros((1, OUT_LANES - HIDDEN - 2), f32)], axis=1)


def init_torch_params(key):
    """Random parameters in native PyTorch layouts ([out, in] weights)."""
    ks = jax.random.split(key, 14)

    def w(k, shape, scale=0.1):
        return jax.random.normal(k, shape, jnp.float32) * scale

    return {
        "pre_proce.weight": w(ks[0], (IN_LSTM, IN_PRE)),
        "pre_proce.bias":   w(ks[1], (IN_LSTM,)),
        "weight_ih_l0":     w(ks[2], (GATES, IN_LSTM)),
        "weight_hh_l0":     w(ks[3], (GATES, HIDDEN)),
        "bias_ih_l0":       w(ks[4], (GATES,)),
        "bias_hh_l0":       w(ks[5], (GATES,)),
        "weight_ih_l1":     w(ks[6], (GATES, HIDDEN)),
        "weight_hh_l1":     w(ks[7], (GATES, HIDDEN)),
        "bias_ih_l1":       w(ks[8], (GATES,)),
        "bias_hh_l1":       w(ks[9], (GATES,)),
        "fc1.weight":       w(ks[10], (HIDDEN, HIDDEN)),
        "fc1.bias":         w(ks[11], (HIDDEN,)),
        "hidden_out.weight": w(ks[12], (2, HIDDEN)),
        "hidden_out.bias":   w(ks[13], (2,)),
    }


def pack_params(p):
    """Pack all parameters into one lane-dense [PROWS, 256] f32 slab.

    * Weights are transposed to [in, out]; LSTM biases pre-folded (b_ih+b_hh).
    * Sigmoid-gate (i, f, o) weight/bias columns are pre-scaled by 0.5 so one
      in-kernel tanh yields sigmoid via 0.5 + 0.5*tanh(z/2); the g gate keeps
      scale 1.  pre_proce is pre-scaled by 0.5 the same way.
    * w_rec block layout: rows 0:32 = [w_hh0 | w_ih1], rows 32:64 = [0 | w_hh1].
    """
    H, G = HIDDEN, GATES
    gscale = jnp.concatenate([jnp.full((2 * H,), 0.5, jnp.float32),
                              jnp.ones((H,), jnp.float32),
                              jnp.full((H,), 0.5, jnp.float32)])      # i,f | g | o

    w_ih0 = p["weight_ih_l0"].T * gscale
    w_hh0 = p["weight_hh_l0"].T * gscale
    b0 = (p["bias_ih_l0"] + p["bias_hh_l0"]) * gscale
    w_ih1 = p["weight_ih_l1"].T * gscale
    w_hh1 = p["weight_hh_l1"].T * gscale
    b1 = (p["bias_ih_l1"] + p["bias_hh_l1"]) * gscale
    w_pre = p["pre_proce.weight"].T * 0.5
    b_pre = p["pre_proce.bias"] * 0.5

    slab = jnp.zeros((PROWS, 2 * G), jnp.float32)
    slab = slab.at[_R_WREC:_R_WREC + H, 0:G].set(w_hh0)
    slab = slab.at[_R_WREC:_R_WREC + H, G:2 * G].set(w_ih1)
    slab = slab.at[_R_WREC + H:_R_WREC + 2 * H, G:2 * G].set(w_hh1)
    slab = slab.at[_R_WIH0:_R_WIH0 + IN_LSTM, 0:G].set(w_ih0)
    slab = slab.at[_R_B0, 0:G].set(b0)
    slab = slab.at[_R_B1, 0:G].set(b1)
    slab = slab.at[_R_WPRE:_R_WPRE + IN_PRE, 0:IN_LSTM].set(w_pre)
    slab = slab.at[_R_BPRE, 0:IN_LSTM].set(b_pre)
    slab = slab.at[_R_HEADW:_R_HEADW + H, 0:H].set(p["fc1.weight"].T)
    slab = slab.at[_R_HEADW:_R_HEADW + H, G:G + 2].set(p["hidden_out.weight"].T)
    slab = slab.at[_R_HEADB, 0:H].set(p["fc1.bias"])
    slab = slab.at[_R_HEADB, G:G + 2].set(p["hidden_out.bias"])
    return slab


def tax_return_lstm_forward(param_slab, x):
    """x: float32 [seq, 2]. Returns (logits [2], feat [32]) like the module."""
    vmem = pl.BlockSpec(memory_space=pltpu.MemorySpace.VMEM)
    out = pl.pallas_call(
        _kernel,
        out_shape=jax.ShapeDtypeStruct((1, OUT_LANES), jnp.float32),
        in_specs=[vmem, vmem],
        out_specs=vmem,
    )(x, param_slab)
    feat = out[0, 0:HIDDEN]
    logits = out[0, HIDDEN:HIDDEN + 2]
    return logits, feat                     # output.squeeze(), x.squeeze()


def reference_forward(p, x):
    """Pure-JAX reference matching the PyTorch module (eval mode)."""
    def sigmoid(z):
        return 1.0 / (1.0 + jnp.exp(-z))

    x10 = sigmoid(x @ p["pre_proce.weight"].T + p["pre_proce.bias"])

    def lstm_layer(inp, w_ih, w_hh, b_ih, b_hh):
        H = HIDDEN
        h = jnp.zeros((H,), jnp.float32)
        c = jnp.zeros((H,), jnp.float32)
        outs = []
        for t in range(inp.shape[0]):
            z = inp[t] @ w_ih.T + b_ih + h @ w_hh.T + b_hh
            i = sigmoid(z[0:H])
            f = sigmoid(z[H:2 * H])
            g = jnp.tanh(z[2 * H:3 * H])
            o = sigmoid(z[3 * H:4 * H])
            c = f * c + i * g
            h = o * jnp.tanh(c)
            outs.append(h)
        return jnp.stack(outs)

    h0seq = lstm_layer(x10, p["weight_ih_l0"], p["weight_hh_l0"],
                       p["bias_ih_l0"], p["bias_hh_l0"])
    h1seq = lstm_layer(h0seq, p["weight_ih_l1"], p["weight_hh_l1"],
                       p["bias_ih_l1"], p["bias_hh_l1"])
    feat = jnp.maximum(h1seq[-1] @ p["fc1.weight"].T + p["fc1.bias"], 0.0)
    logits = feat @ p["hidden_out.weight"].T + p["hidden_out.bias"]
    return logits, feat


if __name__ == "__main__":
    key = jax.random.PRNGKey(0)
    pkey, xkey = jax.random.split(key)

    torch_params = init_torch_params(pkey)
    slab = pack_params(torch_params)

    seq = 8
    x = jax.random.normal(xkey, (seq, IN_PRE), jnp.float32)

    logits, feat = tax_return_lstm_forward(slab, x)
    logits = jax.block_until_ready(logits)
    feat = jax.block_until_ready(feat)

    assert logits.shape == (2,) and logits.dtype == jnp.float32
    assert feat.shape == (HIDDEN,) and feat.dtype == jnp.float32
    assert bool(jnp.all(jnp.isfinite(logits))) and bool(jnp.all(jnp.isfinite(feat)))

    ref_logits, ref_feat = reference_forward(torch_params, x)
    assert bool(jnp.allclose(logits, ref_logits, atol=2e-2, rtol=2e-2))
    assert bool(jnp.allclose(feat, ref_feat, atol=2e-2, rtol=2e-2))

    print("KERNEL_OK")
</pallas_src>

<mosaic_0001>
module attributes {stable_mosaic.version = 11 : i64} {
  func.func @_kernel(%arg0: memref<8x2xf32, #tpu.memory_space<vmem>>, %arg1: memref<120x256xf32, #tpu.memory_space<vmem>>, %arg2: memref<1x128xf32, #tpu.memory_space<vmem>>) attributes {dimension_semantics = [], scalar_prefetch = 0 : i64, scratch_operands = 0 : i64, tpu.core_type = #tpu.core_type<tc>} {
    %c76 = arith.constant 76 : index
    %c0 = arith.constant 0 : index
    %0 = vector.load %arg1[%c76, %c0] : memref<120x256xf32, #tpu.memory_space<vmem>>, vector<2x10xf32>
    %c78 = arith.constant 78 : index
    %c0_0 = arith.constant 0 : index
    %1 = vector.load %arg1[%c78, %c0_0] : memref<120x256xf32, #tpu.memory_space<vmem>>, vector<1x10xf32>
    %c0_1 = arith.constant 0 : index
    %c0_2 = arith.constant 0 : index
    %2 = vector.load %arg0[%c0_1, %c0_2] : memref<8x2xf32, #tpu.memory_space<vmem>>, vector<8x2xf32>
    %cst = arith.constant dense<0.000000e+00> : vector<8x10xf32>
    %3 = tpu.matmul %2, %0, %cst {dimension_numbers = #tpu.dot_dimension_numbers<[1], [0], [0], [1], [0, 0, 1, 1], [], []>} : vector<8x2xf32>, vector<2x10xf32>, vector<8x10xf32> -> vector<8x10xf32>
    %4 = vector.broadcast %1 : vector<1x10xf32> to vector<8x10xf32>
    %5 = arith.addf %3, %4 : vector<8x10xf32>
    %6 = math.tanh %5 : vector<8x10xf32>
    %cst_3 = arith.constant 5.000000e-01 : f32
    %7 = vector.broadcast %cst_3 : f32 to vector<8x10xf32>
    %8 = arith.mulf %7, %6 : vector<8x10xf32>
    %cst_4 = arith.constant 5.000000e-01 : f32
    %9 = vector.broadcast %cst_4 : f32 to vector<8x10xf32>
    %10 = arith.addf %9, %8 : vector<8x10xf32>
    %c64 = arith.constant 64 : index
    %c0_5 = arith.constant 0 : index
    %11 = vector.load %arg1[%c64, %c0_5] : memref<120x256xf32, #tpu.memory_space<vmem>>, vector<10x128xf32>
    %c74 = arith.constant 74 : index
    %c0_6 = arith.constant 0 : index
    %12 = vector.load %arg1[%c74, %c0_6] : memref<120x256xf32, #tpu.memory_space<vmem>>, vector<1x128xf32>
    %c75 = arith.constant 75 : index
    %c0_7 = arith.constant 0 : index
    %13 = vector.load %arg1[%c75, %c0_7] : memref<120x256xf32, #tpu.memory_space<vmem>>, vector<1x128xf32>
    %cst_8 = arith.constant dense<0.000000e+00> : vector<8x128xf32>
    %14 = tpu.matmul %10, %11, %cst_8 {dimension_numbers = #tpu.dot_dimension_numbers<[1], [0], [0], [1], [0, 0, 1, 1], [], []>} : vector<8x10xf32>, vector<10x128xf32>, vector<8x128xf32> -> vector<8x128xf32>
    %15 = vector.broadcast %12 : vector<1x128xf32> to vector<8x128xf32>
    %16 = arith.addf %14, %15 : vector<8x128xf32>
    %cst_9 = arith.constant 0.000000e+00 : f32
    %17 = vector.broadcast %cst_9 : f32 to vector<1x128xf32>
    %18 = tpu.concatenate %16, %17 in 0 : vector<8x128xf32>, vector<1x128xf32> -> vector<9x128xf32>
    %19 = vector.shape_cast %13 : vector<1x128xf32> to vector<1x128xf32>
    %20 = vector.broadcast %19 : vector<1x128xf32> to vector<9x128xf32>
    %21 = tpu.concatenate %18, %20 in 1 : vector<9x128xf32>, vector<9x128xf32> -> vector<9x256xf32>
    %c0_10 = arith.constant 0 : index
    %c0_11 = arith.constant 0 : index
    %22 = vector.load %arg1[%c0_10, %c0_11] : memref<120x256xf32, #tpu.memory_space<vmem>>, vector<64x256xf32>
    %23 = tpu.iota {dimensions = array<i32: 1>} : vector<1x256xi32>
    %c127_i32 = arith.constant 127 : i32
    %24 = vector.broadcast %c127_i32 : i32 to vector<1x256xi32>
    %25 = arith.andi %23, %24 : vector<1x256xi32>
    %c64_i32 = arith.constant 64 : i32
    %26 = vector.broadcast %c64_i32 : i32 to vector<1x256xi32>
    %27 = arith.cmpi sge, %25, %26 : vector<1x256xi32>
    %c96_i32 = arith.constant 96 : i32
    %28 = vector.broadcast %c96_i32 : i32 to vector<1x256xi32>
    %29 = arith.cmpi slt, %25, %28 : vector<1x256xi32>
    %30 = arith.andi %27, %29 : vector<1x256xi1>
    %cst_12 = arith.constant 0.000000e+00 : f32
    %31 = vector.broadcast %cst_12 : f32 to vector<1x32xf32>
    %cst_13 = arith.constant 0.000000e+00 : f32
    %32 = vector.broadcast %cst_13 : f32 to vector<1x32xf32>
    %cst_14 = arith.constant 0.000000e+00 : f32
    %33 = vector.broadcast %cst_14 : f32 to vector<1x32xf32>
    %cst_15 = arith.constant 0.000000e+00 : f32
    %34 = vector.broadcast %cst_15 : f32 to vector<1x32xf32>
    %35 = tpu.concatenate %31, %33 in 1 : vector<1x32xf32>, vector<1x32xf32> -> vector<1x64xf32>
    %cst_16 = arith.constant dense<0.000000e+00> : vector<1x256xf32>
    %36 = tpu.matmul %35, %22, %cst_16 {dimension_numbers = #tpu.dot_dimension_numbers<[1], [0], [0], [1], [0, 0, 1, 1], [], []>} : vector<1x64xf32>, vector<64x256xf32>, vector<1x256xf32> -> vector<1x256xf32>
    %37 = vector.extract_strided_slice %21 {offsets = [0, 0], sizes = [1, 256], strides = [1, 1]} : vector<9x256xf32> to vector<1x256xf32>
    %38 = arith.addf %36, %37 : vector<1x256xf32>
    %39 = math.tanh %38 : vector<1x256xf32>
    %cst_17 = arith.constant 5.000000e-01 : f32
    %40 = vector.broadcast %cst_17 : f32 to vector<1x256xf32>
    %41 = arith.mulf %40, %39 : vector<1x256xf32>
    %cst_18 = arith.constant 5.000000e-01 : f32
    %42 = vector.broadcast %cst_18 : f32 to vector<1x256xf32>
    %43 = arith.addf %42, %41 : vector<1x256xf32>
    %44 = arith.select %30, %39, %43 : vector<1x256xi1>, vector<1x256xf32>
    %45 = vector.extract_strided_slice %44 {offsets = [0, 32], sizes = [1, 32], strides = [1, 1]} : vector<1x256xf32> to vector<1x32xf32>
    %46 = arith.mulf %45, %32 : vector<1x32xf32>
    %47 = vector.extract_strided_slice %44 {offsets = [0, 0], sizes = [1, 32], strides = [1, 1]} : vector<1x256xf32> to vector<1x32xf32>
    %48 = vector.extract_strided_slice %44 {offsets = [0, 64], sizes = [1, 32], strides = [1, 1]} : vector<1x256xf32> to vector<1x32xf32>
    %49 = arith.mulf %47, %48 : vector<1x32xf32>
    %50 = arith.addf %46, %49 : vector<1x32xf32>
    %51 = tpu.concatenate %50, %34 in 1 : vector<1x32xf32>, vector<1x32xf32> -> vector<1x64xf32>
    %52 = math.tanh %51 : vector<1x64xf32>
    %53 = vector.extract_strided_slice %44 {offsets = [0, 96], sizes = [1, 32], strides = [1, 1]} : vector<1x256xf32> to vector<1x32xf32>
    %54 = vector.extract_strided_slice %52 {offsets = [0, 0], sizes = [1, 32], strides = [1, 1]} : vector<1x64xf32> to vector<1x32xf32>
    %55 = arith.mulf %53, %54 : vector<1x32xf32>
    %56 = tpu.concatenate %55, %33 in 1 : vector<1x32xf32>, vector<1x32xf32> -> vector<1x64xf32>
    %cst_19 = arith.constant dense<0.000000e+00> : vector<1x256xf32>
    %57 = tpu.matmul %56, %22, %cst_19 {dimension_numbers = #tpu.dot_dimension_numbers<[1], [0], [0], [1], [0, 0, 1, 1], [], []>} : vector<1x64xf32>, vector<64x256xf32>, vector<1x256xf32> -> vector<1x256xf32>
    %58 = vector.extract_strided_slice %21 {offsets = [1, 0], sizes = [1, 256], strides = [1, 1]} : vector<9x256xf32> to vector<1x256xf32>
    %59 = arith.addf %57, %58 : vector<1x256xf32>
    %60 = math.tanh %59 : vector<1x256xf32>
    %cst_20 = arith.constant 5.000000e-01 : f32
    %61 = vector.broadcast %cst_20 : f32 to vector<1x256xf32>
    %62 = arith.mulf %61, %60 : vector<1x256xf32>
    %cst_21 = arith.constant 5.000000e-01 : f32
    %63 = vector.broadcast %cst_21 : f32 to vector<1x256xf32>
    %64 = arith.addf %63, %62 : vector<1x256xf32>
    %65 = arith.select %30, %60, %64 : vector<1x256xi1>, vector<1x256xf32>
    %66 = vector.extract_strided_slice %65 {offsets = [0, 32], sizes = [1, 32], strides = [1, 1]} : vector<1x256xf32> to vector<1x32xf32>
    %67 = arith.mulf %66, %50 : vector<1x32xf32>
    %68 = vector.extract_strided_slice %65 {offsets = [0, 0], sizes = [1, 32], strides = [1, 1]} : vector<1x256xf32> to vector<1x32xf32>
    %69 = vector.extract_strided_slice %65 {offsets = [0, 64], sizes = [1, 32], strides = [1, 1]} : vector<1x256xf32> to vector<1x32xf32>
    %70 = arith.mulf %68, %69 : vector<1x32xf32>
    %71 = arith.addf %67, %70 : vector<1x32xf32>
    %72 = vector.extract_strided_slice %65 {offsets = [0, 160], sizes = [1, 32], strides = [1, 1]} : vector<1x256xf32> to vector<1x32xf32>
    %73 = arith.mulf %72, %34 : vector<1x32xf32>
    %74 = vector.extract_strided_slice %65 {offsets = [0, 128], sizes = [1, 32], strides = [1, 1]} : vector<1x256xf32> to vector<1x32xf32>
    %75 = vector.extract_strided_slice %65 {offsets = [0, 192], sizes = [1, 32], strides = [1, 1]} : vector<1x256xf32> to vector<1x32xf32>
    %76 = arith.mulf %74, %75 : vector<1x32xf32>
    %77 = arith.addf %73, %76 : vector<1x32xf32>
    %78 = tpu.concatenate %71, %77 in 1 : vector<1x32xf32>, vector<1x32xf32> -> vector<1x64xf32>
    %79 = math.tanh %78 : vector<1x64xf32>
    %80 = vector.extract_strided_slice %65 {offsets = [0, 96], sizes = [1, 32], strides = [1, 1]} : vector<1x256xf32> to vector<1x32xf32>
    %81 = vector.extract_strided_slice %79 {offsets = [0, 0], sizes = [1, 32], strides = [1, 1]} : vector<1x64xf32> to vector<1x32xf32>
    %82 = arith.mulf %80, %81 : vector<1x32xf32>
    %83 = vector.extract_strided_slice %65 {offsets = [0, 224], sizes = [1, 32], strides = [1, 1]} : vector<1x256xf32> to vector<1x32xf32>
    %84 = vector.extract_strided_slice %79 {offsets = [0, 32], sizes = [1, 32], strides = [1, 1]} : vector<1x64xf32> to vector<1x32xf32>
    %85 = arith.mulf %83, %84 : vector<1x32xf32>
    %86 = tpu.concatenate %82, %85 in 1 : vector<1x32xf32>, vector<1x32xf32> -> vector<1x64xf32>
    %cst_22 = arith.constant dense<0.000000e+00> : vector<1x256xf32>
    %87 = tpu.matmul %86, %22, %cst_22 {dimension_numbers = #tpu.dot_dimension_numbers<[1], [0], [0], [1], [0, 0, 1, 1], [], []>} : vector<1x64xf32>, vector<64x256xf32>, vector<1x256xf32> -> vector<1x256xf32>
    %88 = vector.extract_strided_slice %21 {offsets = [2, 0], sizes = [1, 256], strides = [1, 1]} : vector<9x256xf32> to vector<1x256xf32>
    %89 = arith.addf %87, %88 : vector<1x256xf32>
    %90 = math.tanh %89 : vector<1x256xf32>
    %cst_23 = arith.constant 5.000000e-01 : f32
    %91 = vector.broadcast %cst_23 : f32 to vector<1x256xf32>
    %92 = arith.mulf %91, %90 : vector<1x256xf32>
    %cst_24 = arith.constant 5.000000e-01 : f32
    %93 = vector.broadcast %cst_24 : f32 to vector<1x256xf32>
    %94 = arith.addf %93, %92 : vector<1x256xf32>
    %95 = arith.select %30, %90, %94 : vector<1x256xi1>, vector<1x256xf32>
    %96 = vector.extract_strided_slice %95 {offsets = [0, 32], sizes = [1, 32], strides = [1, 1]} : vector<1x256xf32> to vector<1x32xf32>
    %97 = arith.mulf %96, %71 : vector<1x32xf32>
    %98 = vector.extract_strided_slice %95 {offsets = [0, 0], sizes = [1, 32], strides = [1, 1]} : vector<1x256xf32> to vector<1x32xf32>
    %99 = vector.extract_strided_slice %95 {offsets = [0, 64], sizes = [1, 32], strides = [1, 1]} : vector<1x256xf32> to vector<1x32xf32>
    %100 = arith.mulf %98, %99 : vector<1x32xf32>
    %101 = arith.addf %97, %100 : vector<1x32xf32>
    %102 = vector.extract_strided_slice %95 {offsets = [0, 160], sizes = [1, 32], strides = [1, 1]} : vector<1x256xf32> to vector<1x32xf32>
    %103 = arith.mulf %102, %77 : vector<1x32xf32>
    %104 = vector.extract_strided_slice %95 {offsets = [0, 128], sizes = [1, 32], strides = [1, 1]} : vector<1x256xf32> to vector<1x32xf32>
    %105 = vector.extract_strided_slice %95 {offsets = [0, 192], sizes = [1, 32], strides = [1, 1]} : vector<1x256xf32> to vector<1x32xf32>
    %106 = arith.mulf %104, %105 : vector<1x32xf32>
    %107 = arith.addf %103, %106 : vector<1x32xf32>
    %108 = tpu.concatenate %101, %107 in 1 : vector<1x32xf32>, vector<1x32xf32> -> vector<1x64xf32>
    %109 = math.tanh %108 : vector<1x64xf32>
    %110 = vector.extract_strided_slice %95 {offsets = [0, 96], sizes = [1, 32], strides = [1, 1]} : vector<1x256xf32> to vector<1x32xf32>
    %111 = vector.extract_strided_slice %109 {offsets = [0, 0], sizes = [1, 32], strides = [1, 1]} : vector<1x64xf32> to vector<1x32xf32>
    %112 = arith.mulf %110, %111 : vector<1x32xf32>
    %113 = vector.extract_strided_slice %95 {offsets = [0, 224], sizes = [1, 32], strides = [1, 1]} : vector<1x256xf32> to vector<1x32xf32>
    %114 = vector.extract_strided_slice %109 {offsets = [0, 32], sizes = [1, 32], strides = [1, 1]} : vector<1x64xf32> to vector<1x32xf32>
    %115 = arith.mulf %113, %114 : vector<1x32xf32>
    %116 = tpu.concatenate %112, %115 in 1 : vector<1x32xf32>, vector<1x32xf32> -> vector<1x64xf32>
    %cst_25 = arith.constant dense<0.000000e+00> : vector<1x256xf32>
    %117 = tpu.matmul %116, %22, %cst_25 {dimension_numbers = #tpu.dot_dimension_numbers<[1], [0], [0], [1], [0, 0, 1, 1], [], []>} : vector<1x64xf32>, vector<64x256xf32>, vector<1x256xf32> -> vector<1x256xf32>
    %118 = vector.extract_strided_slice %21 {offsets = [3, 0], sizes = [1, 256], strides = [1, 1]} : vector<9x256xf32> to vector<1x256xf32>
    %119 = arith.addf %117, %118 : vector<1x256xf32>
    %120 = math.tanh %119 : vector<1x256xf32>
    %cst_26 = arith.constant 5.000000e-01 : f32
    %121 = vector.broadcast %cst_26 : f32 to vector<1x256xf32>
    %122 = arith.mulf %121, %120 : vector<1x256xf32>
    %cst_27 = arith.constant 5.000000e-01 : f32
    %123 = vector.broadcast %cst_27 : f32 to vector<1x256xf32>
    %124 = arith.addf %123, %122 : vector<1x256xf32>
    %125 = arith.select %30, %120, %124 : vector<1x256xi1>, vector<1x256xf32>
    %126 = vector.extract_strided_slice %125 {offsets = [0, 32], sizes = [1, 32], strides = [1, 1]} : vector<1x256xf32> to vector<1x32xf32>
    %127 = arith.mulf %126, %101 : vector<1x32xf32>
    %128 = vector.extract_strided_slice %125 {offsets = [0, 0], sizes = [1, 32], strides = [1, 1]} : vector<1x256xf32> to vector<1x32xf32>
    %129 = vector.extract_strided_slice %125 {offsets = [0, 64], sizes = [1, 32], strides = [1, 1]} : vector<1x256xf32> to vector<1x32xf32>
    %130 = arith.mulf %128, %129 : vector<1x32xf32>
    %131 = arith.addf %127, %130 : vector<1x32xf32>
    %132 = vector.extract_strided_slice %125 {offsets = [0, 160], sizes = [1, 32], strides = [1, 1]} : vector<1x256xf32> to vector<1x32xf32>
    %133 = arith.mulf %132, %107 : vector<1x32xf32>
    %134 = vector.extract_strided_slice %125 {offsets = [0, 128], sizes = [1, 32], strides = [1, 1]} : vector<1x256xf32> to vector<1x32xf32>
    %135 = vector.extract_strided_slice %125 {offsets = [0, 192], sizes = [1, 32], strides = [1, 1]} : vector<1x256xf32> to vector<1x32xf32>
    %136 = arith.mulf %134, %135 : vector<1x32xf32>
    %137 = arith.addf %133, %136 : vector<1x32xf32>
    %138 = tpu.concatenate %131, %137 in 1 : vector<1x32xf32>, vector<1x32xf32> -> vector<1x64xf32>
    %139 = math.tanh %138 : vector<1x64xf32>
    %140 = vector.extract_strided_slice %125 {offsets = [0, 96], sizes = [1, 32], strides = [1, 1]} : vector<1x256xf32> to vector<1x32xf32>
    %141 = vector.extract_strided_slice %139 {offsets = [0, 0], sizes = [1, 32], strides = [1, 1]} : vector<1x64xf32> to vector<1x32xf32>
    %142 = arith.mulf %140, %141 : vector<1x32xf32>
    %143 = vector.extract_strided_slice %125 {offsets = [0, 224], sizes = [1, 32], strides = [1, 1]} : vector<1x256xf32> to vector<1x32xf32>
    %144 = vector.extract_strided_slice %139 {offsets = [0, 32], sizes = [1, 32], strides = [1, 1]} : vector<1x64xf32> to vector<1x32xf32>
    %145 = arith.mulf %143, %144 : vector<1x32xf32>
    %146 = tpu.concatenate %142, %145 in 1 : vector<1x32xf32>, vector<1x32xf32> -> vector<1x64xf32>
    %cst_28 = arith.constant dense<0.000000e+00> : vector<1x256xf32>
    %147 = tpu.matmul %146, %22, %cst_28 {dimension_numbers = #tpu.dot_dimension_numbers<[1], [0], [0], [1], [0, 0, 1, 1], [], []>} : vector<1x64xf32>, vector<64x256xf32>, vector<1x256xf32> -> vector<1x256xf32>
    %148 = vector.extract_strided_slice %21 {offsets = [4, 0], sizes = [1, 256], strides = [1, 1]} : vector<9x256xf32> to vector<1x256xf32>
    %149 = arith.addf %147, %148 : vector<1x256xf32>
    %150 = math.tanh %149 : vector<1x256xf32>
    %cst_29 = arith.constant 5.000000e-01 : f32
    %151 = vector.broadcast %cst_29 : f32 to vector<1x256xf32>
    %152 = arith.mulf %151, %150 : vector<1x256xf32>
    %cst_30 = arith.constant 5.000000e-01 : f32
    %153 = vector.broadcast %cst_30 : f32 to vector<1x256xf32>
    %154 = arith.addf %153, %152 : vector<1x256xf32>
    %155 = arith.select %30, %150, %154 : vector<1x256xi1>, vector<1x256xf32>
    %156 = vector.extract_strided_slice %155 {offsets = [0, 32], sizes = [1, 32], strides = [1, 1]} : vector<1x256xf32> to vector<1x32xf32>
    %157 = arith.mulf %156, %131 : vector<1x32xf32>
    %158 = vector.extract_strided_slice %155 {offsets = [0, 0], sizes = [1, 32], strides = [1, 1]} : vector<1x256xf32> to vector<1x32xf32>
    %159 = vector.extract_strided_slice %155 {offsets = [0, 64], sizes = [1, 32], strides = [1, 1]} : vector<1x256xf32> to vector<1x32xf32>
    %160 = arith.mulf %158, %159 : vector<1x32xf32>
    %161 = arith.addf %157, %160 : vector<1x32xf32>
    %162 = vector.extract_strided_slice %155 {offsets = [0, 160], sizes = [1, 32], strides = [1, 1]} : vector<1x256xf32> to vector<1x32xf32>
    %163 = arith.mulf %162, %137 : vector<1x32xf32>
    %164 = vector.extract_strided_slice %155 {offsets = [0, 128], sizes = [1, 32], strides = [1, 1]} : vector<1x256xf32> to vector<1x32xf32>
    %165 = vector.extract_strided_slice %155 {offsets = [0, 192], sizes = [1, 32], strides = [1, 1]} : vector<1x256xf32> to vector<1x32xf32>
    %166 = arith.mulf %164, %165 : vector<1x32xf32>
    %167 = arith.addf %163, %166 : vector<1x32xf32>
    %168 = tpu.concatenate %161, %167 in 1 : vector<1x32xf32>, vector<1x32xf32> -> vector<1x64xf32>
    %169 = math.tanh %168 : vector<1x64xf32>
    %170 = vector.extract_strided_slice %155 {offsets = [0, 96], sizes = [1, 32], strides = [1, 1]} : vector<1x256xf32> to vector<1x32xf32>
    %171 = vector.extract_strided_slice %169 {offsets = [0, 0], sizes = [1, 32], strides = [1, 1]} : vector<1x64xf32> to vector<1x32xf32>
    %172 = arith.mulf %170, %171 : vector<1x32xf32>
    %173 = vector.extract_strided_slice %155 {offsets = [0, 224], sizes = [1, 32], strides = [1, 1]} : vector<1x256xf32> to vector<1x32xf32>
    %174 = vector.extract_strided_slice %169 {offsets = [0, 32], sizes = [1, 32], strides = [1, 1]} : vector<1x64xf32> to vector<1x32xf32>
    %175 = arith.mulf %173, %174 : vector<1x32xf32>
    %176 = tpu.concatenate %172, %175 in 1 : vector<1x32xf32>, vector<1x32xf32> -> vector<1x64xf32>
    %cst_31 = arith.constant dense<0.000000e+00> : vector<1x256xf32>
    %177 = tpu.matmul %176, %22, %cst_31 {dimension_numbers = #tpu.dot_dimension_numbers<[1], [0], [0], [1], [0, 0, 1, 1], [], []>} : vector<1x64xf32>, vector<64x256xf32>, vector<1x256xf32> -> vector<1x256xf32>
    %178 = vector.extract_strided_slice %21 {offsets = [5, 0], sizes = [1, 256], strides = [1, 1]} : vector<9x256xf32> to vector<1x256xf32>
    %179 = arith.addf %177, %178 : vector<1x256xf32>
    %180 = math.tanh %179 : vector<1x256xf32>
    %cst_32 = arith.constant 5.000000e-01 : f32
    %181 = vector.broadcast %cst_32 : f32 to vector<1x256xf32>
    %182 = arith.mulf %181, %180 : vector<1x256xf32>
    %cst_33 = arith.constant 5.000000e-01 : f32
    %183 = vector.broadcast %cst_33 : f32 to vector<1x256xf32>
    %184 = arith.addf %183, %182 : vector<1x256xf32>
    %185 = arith.select %30, %180, %184 : vector<1x256xi1>, vector<1x256xf32>
    %186 = vector.extract_strided_slice %185 {offsets = [0, 32], sizes = [1, 32], strides = [1, 1]} : vector<1x256xf32> to vector<1x32xf32>
    %187 = arith.mulf %186, %161 : vector<1x32xf32>
    %188 = vector.extract_strided_slice %185 {offsets = [0, 0], sizes = [1, 32], strides = [1, 1]} : vector<1x256xf32> to vector<1x32xf32>
    %189 = vector.extract_strided_slice %185 {offsets = [0, 64], sizes = [1, 32], strides = [1, 1]} : vector<1x256xf32> to vector<1x32xf32>
    %190 = arith.mulf %188, %189 : vector<1x32xf32>
    %191 = arith.addf %187, %190 : vector<1x32xf32>
    %192 = vector.extract_strided_slice %185 {offsets = [0, 160], sizes = [1, 32], strides = [1, 1]} : vector<1x256xf32> to vector<1x32xf32>
    %193 = arith.mulf %192, %167 : vector<1x32xf32>
    %194 = vector.extract_strided_slice %185 {offsets = [0, 128], sizes = [1, 32], strides = [1, 1]} : vector<1x256xf32> to vector<1x32xf32>
    %195 = vector.extract_strided_slice %185 {offsets = [0, 192], sizes = [1, 32], strides = [1, 1]} : vector<1x256xf32> to vector<1x32xf32>
    %196 = arith.mulf %194, %195 : vector<1x32xf32>
    %197 = arith.addf %193, %196 : vector<1x32xf32>
    %198 = tpu.concatenate %191, %197 in 1 : vector<1x32xf32>, vector<1x32xf32> -> vector<1x64xf32>
    %199 = math.tanh %198 : vector<1x64xf32>
    %200 = vector.extract_strided_slice %185 {offsets = [0, 96], sizes = [1, 32], strides = [1, 1]} : vector<1x256xf32> to vector<1x32xf32>
    %201 = vector.extract_strided_slice %199 {offsets = [0, 0], sizes = [1, 32], strides = [1, 1]} : vector<1x64xf32> to vector<1x32xf32>
    %202 = arith.mulf %200, %201 : vector<1x32xf32>
    %203 = vector.extract_strided_slice %185 {offsets = [0, 224], sizes = [1, 32], strides = [1, 1]} : vector<1x256xf32> to vector<1x32xf32>
    %204 = vector.extract_strided_slice %199 {offsets = [0, 32], sizes = [1, 32], strides = [1, 1]} : vector<1x64xf32> to vector<1x32xf32>
    %205 = arith.mulf %203, %204 : vector<1x32xf32>
    %206 = tpu.concatenate %202, %205 in 1 : vector<1x32xf32>, vector<1x32xf32> -> vector<1x64xf32>
    %cst_34 = arith.constant dense<0.000000e+00> : vector<1x256xf32>
    %207 = tpu.matmul %206, %22, %cst_34 {dimension_numbers = #tpu.dot_dimension_numbers<[1], [0], [0], [1], [0, 0, 1, 1], [], []>} : vector<1x64xf32>, vector<64x256xf32>, vector<1x256xf32> -> vector<1x256xf32>
    %208 = vector.extract_strided_slice %21 {offsets = [6, 0], sizes = [1, 256], strides = [1, 1]} : vector<9x256xf32> to vector<1x256xf32>
    %209 = arith.addf %207, %208 : vector<1x256xf32>
    %210 = math.tanh %209 : vector<1x256xf32>
    %cst_35 = arith.constant 5.000000e-01 : f32
    %211 = vector.broadcast %cst_35 : f32 to vector<1x256xf32>
    %212 = arith.mulf %211, %210 : vector<1x256xf32>
    %cst_36 = arith.constant 5.000000e-01 : f32
    %213 = vector.broadcast %cst_36 : f32 to vector<1x256xf32>
    %214 = arith.addf %213, %212 : vector<1x256xf32>
    %215 = arith.select %30, %210, %214 : vector<1x256xi1>, vector<1x256xf32>
    %216 = vector.extract_strided_slice %215 {offsets = [0, 32], sizes = [1, 32], strides = [1, 1]} : vector<1x256xf32> to vector<1x32xf32>
    %217 = arith.mulf %216, %191 : vector<1x32xf32>
    %218 = vector.extract_strided_slice %215 {offsets = [0, 0], sizes = [1, 32], strides = [1, 1]} : vector<1x256xf32> to vector<1x32xf32>
    %219 = vector.extract_strided_slice %215 {offsets = [0, 64], sizes = [1, 32], strides = [1, 1]} : vector<1x256xf32> to vector<1x32xf32>
    %220 = arith.mulf %218, %219 : vector<1x32xf32>
    %221 = arith.addf %217, %220 : vector<1x32xf32>
    %222 = vector.extract_strided_slice %215 {offsets = [0, 160], sizes = [1, 32], strides = [1, 1]} : vector<1x256xf32> to vector<1x32xf32>
    %223 = arith.mulf %222, %197 : vector<1x32xf32>
    %224 = vector.extract_strided_slice %215 {offsets = [0, 128], sizes = [1, 32], strides = [1, 1]} : vector<1x256xf32> to vector<1x32xf32>
    %225 = vector.extract_strided_slice %215 {offsets = [0, 192], sizes = [1, 32], strides = [1, 1]} : vector<1x256xf32> to vector<1x32xf32>
    %226 = arith.mulf %224, %225 : vector<1x32xf32>
    %227 = arith.addf %223, %226 : vector<1x32xf32>
    %228 = tpu.concatenate %221, %227 in 1 : vector<1x32xf32>, vector<1x32xf32> -> vector<1x64xf32>
    %229 = math.tanh %228 : vector<1x64xf32>
    %230 = vector.extract_strided_slice %215 {offsets = [0, 96], sizes = [1, 32], strides = [1, 1]} : vector<1x256xf32> to vector<1x32xf32>
    %231 = vector.extract_strided_slice %229 {offsets = [0, 0], sizes = [1, 32], strides = [1, 1]} : vector<1x64xf32> to vector<1x32xf32>
    %232 = arith.mulf %230, %231 : vector<1x32xf32>
    %233 = vector.extract_strided_slice %215 {offsets = [0, 224], sizes = [1, 32], strides = [1, 1]} : vector<1x256xf32> to vector<1x32xf32>
    %234 = vector.extract_strided_slice %229 {offsets = [0, 32], sizes = [1, 32], strides = [1, 1]} : vector<1x64xf32> to vector<1x32xf32>
    %235 = arith.mulf %233, %234 : vector<1x32xf32>
    %236 = tpu.concatenate %232, %235 in 1 : vector<1x32xf32>, vector<1x32xf32> -> vector<1x64xf32>
    %cst_37 = arith.constant dense<0.000000e+00> : vector<1x256xf32>
    %237 = tpu.matmul %236, %22, %cst_37 {dimension_numbers = #tpu.dot_dimension_numbers<[1], [0], [0], [1], [0, 0, 1, 1], [], []>} : vector<1x64xf32>, vector<64x256xf32>, vector<1x256xf32> -> vector<1x256xf32>
    %238 = vector.extract_strided_slice %21 {offsets = [7, 0], sizes = [1, 256], strides = [1, 1]} : vector<9x256xf32> to vector<1x256xf32>
    %239 = arith.addf %237, %238 : vector<1x256xf32>
    %240 = math.tanh %239 : vector<1x256xf32>
    %cst_38 = arith.constant 5.000000e-01 : f32
    %241 = vector.broadcast %cst_38 : f32 to vector<1x256xf32>
    %242 = arith.mulf %241, %240 : vector<1x256xf32>
    %cst_39 = arith.constant 5.000000e-01 : f32
    %243 = vector.broadcast %cst_39 : f32 to vector<1x256xf32>
    %244 = arith.addf %243, %242 : vector<1x256xf32>
    %245 = arith.select %30, %240, %244 : vector<1x256xi1>, vector<1x256xf32>
    %246 = vector.extract_strided_slice %245 {offsets = [0, 32], sizes = [1, 32], strides = [1, 1]} : vector<1x256xf32> to vector<1x32xf32>
    %247 = arith.mulf %246, %221 : vector<1x32xf32>
    %248 = vector.extract_strided_slice %245 {offsets = [0, 0], sizes = [1, 32], strides = [1, 1]} : vector<1x256xf32> to vector<1x32xf32>
    %249 = vector.extract_strided_slice %245 {offsets = [0, 64], sizes = [1, 32], strides = [1, 1]} : vector<1x256xf32> to vector<1x32xf32>
    %250 = arith.mulf %248, %249 : vector<1x32xf32>
    %251 = arith.addf %247, %250 : vector<1x32xf32>
    %252 = vector.extract_strided_slice %245 {offsets = [0, 160], sizes = [1, 32], strides = [1, 1]} : vector<1x256xf32> to vector<1x32xf32>
    %253 = arith.mulf %252, %227 : vector<1x32xf32>
    %254 = vector.extract_strided_slice %245 {offsets = [0, 128], sizes = [1, 32], strides = [1, 1]} : vector<1x256xf32> to vector<1x32xf32>
    %255 = vector.extract_strided_slice %245 {offsets = [0, 192], sizes = [1, 32], strides = [1, 1]} : vector<1x256xf32> to vector<1x32xf32>
    %256 = arith.mulf %254, %255 : vector<1x32xf32>
    %257 = arith.addf %253, %256 : vector<1x32xf32>
    %258 = tpu.concatenate %251, %257 in 1 : vector<1x32xf32>, vector<1x32xf32> -> vector<1x64xf32>
    %259 = math.tanh %258 : vector<1x64xf32>
    %260 = vector.extract_strided_slice %245 {offsets = [0, 96], sizes = [1, 32], strides = [1, 1]} : vector<1x256xf32> to vector<1x32xf32>
    %261 = vector.extract_strided_slice %259 {offsets = [0, 0], sizes = [1, 32], strides = [1, 1]} : vector<1x64xf32> to vector<1x32xf32>
    %262 = arith.mulf %260, %261 : vector<1x32xf32>
    %263 = vector.extract_strided_slice %245 {offsets = [0, 224], sizes = [1, 32], strides = [1, 1]} : vector<1x256xf32> to vector<1x32xf32>
    %264 = vector.extract_strided_slice %259 {offsets = [0, 32], sizes = [1, 32], strides = [1, 1]} : vector<1x64xf32> to vector<1x32xf32>
    %265 = arith.mulf %263, %264 : vector<1x32xf32>
    %266 = tpu.concatenate %262, %265 in 1 : vector<1x32xf32>, vector<1x32xf32> -> vector<1x64xf32>
    %cst_40 = arith.constant dense<0.000000e+00> : vector<1x256xf32>
    %267 = tpu.matmul %266, %22, %cst_40 {dimension_numbers = #tpu.dot_dimension_numbers<[1], [0], [0], [1], [0, 0, 1, 1], [], []>} : vector<1x64xf32>, vector<64x256xf32>, vector<1x256xf32> -> vector<1x256xf32>
    %268 = vector.extract_strided_slice %21 {offsets = [8, 0], sizes = [1, 256], strides = [1, 1]} : vector<9x256xf32> to vector<1x256xf32>
    %269 = arith.addf %267, %268 : vector<1x256xf32>
    %270 = math.tanh %269 : vector<1x256xf32>
    %cst_41 = arith.constant 5.000000e-01 : f32
    %271 = vector.broadcast %cst_41 : f32 to vector<1x256xf32>
    %272 = arith.mulf %271, %270 : vector<1x256xf32>
    %cst_42 = arith.constant 5.000000e-01 : f32
    %273 = vector.broadcast %cst_42 : f32 to vector<1x256xf32>
    %274 = arith.addf %273, %272 : vector<1x256xf32>
    %275 = arith.select %30, %270, %274 : vector<1x256xi1>, vector<1x256xf32>
    %276 = vector.extract_strided_slice %275 {offsets = [0, 160], sizes = [1, 32], strides = [1, 1]} : vector<1x256xf32> to vector<1x32xf32>
    %277 = arith.mulf %276, %257 : vector<1x32xf32>
    %278 = vector.extract_strided_slice %275 {offsets = [0, 128], sizes = [1, 32], strides = [1, 1]} : vector<1x256xf32> to vector<1x32xf32>
    %279 = vector.extract_strided_slice %275 {offsets = [0, 192], sizes = [1, 32], strides = [1, 1]} : vector<1x256xf32> to vector<1x32xf32>
    %280 = arith.mulf %278, %279 : vector<1x32xf32>
    %281 = arith.addf %277, %280 : vector<1x32xf32>
    %282 = tpu.concatenate %251, %281 in 1 : vector<1x32xf32>, vector<1x32xf32> -> vector<1x64xf32>
    %283 = math.tanh %282 : vector<1x64xf32>
    %284 = vector.extract_strided_slice %275 {offsets = [0, 224], sizes = [1, 32], strides = [1, 1]} : vector<1x256xf32> to vector<1x32xf32>
    %285 = vector.extract_strided_slice %283 {offsets = [0, 32], sizes = [1, 32], strides = [1, 1]} : vector<1x64xf32> to vector<1x32xf32>
    %286 = arith.mulf %284, %285 : vector<1x32xf32>
    %c80 = arith.constant 80 : index
    %c0_43 = arith.constant 0 : index
    %287 = vector.load %arg1[%c80, %c0_43] : memref<120x256xf32, #tpu.memory_space<vmem>>, vector<32x32xf32>
    %c80_44 = arith.constant 80 : index
    %c128 = arith.constant 128 : index
    %288 = vector.load %arg1[%c80_44, %c128] : memref<120x256xf32, #tpu.memory_space<vmem>>, vector<32x2xf32>
    %c112 = arith.constant 112 : index
    %c0_45 = arith.constant 0 : index
    %289 = vector.load %arg1[%c112, %c0_45] : memref<120x256xf32, #tpu.memory_space<vmem>>, vector<1x32xf32>
    %c112_46 = arith.constant 112 : index
    %c128_47 = arith.constant 128 : index
    %290 = vector.load %arg1[%c112_46, %c128_47] : memref<120x256xf32, #tpu.memory_space<vmem>>, vector<1x2xf32>
    %cst_48 = arith.constant dense<0.000000e+00> : vector<1x32xf32>
    %291 = tpu.matmul %286, %287, %cst_48 {dimension_numbers = #tpu.dot_dimension_numbers<[1], [0], [0], [1], [0, 0, 1, 1], [], []>} : vector<1x32xf32>, vector<32x32xf32>, vector<1x32xf32> -> vector<1x32xf32>
    %292 = arith.addf %291, %289 : vector<1x32xf32>
    %cst_49 = arith.constant 0.000000e+00 : f32
    %293 = vector.broadcast %cst_49 : f32 to vector<1x32xf32>
    %294 = arith.maximumf %292, %293 : vector<1x32xf32>
    %cst_50 = arith.constant dense<0.000000e+00> : vector<1x2xf32>
    %295 = tpu.matmul %294, %288, %cst_50 {dimension_numbers = #tpu.dot_dimension_numbers<[1], [0], [0], [1], [0, 0, 1, 1], [], []>} : vector<1x32xf32>, vector<32x2xf32>, vector<1x2xf32> -> vector<1x2xf32>
    %296 = arith.addf %295, %290 : vector<1x2xf32>
    %cst_51 = arith.constant 0.000000e+00 : f32
    %297 = vector.broadcast %cst_51 : f32 to vector<1x94xf32>
    %298 = tpu.concatenate %294, %296, %297 in 1 : vector<1x32xf32>, vector<1x2xf32>, vector<1x94xf32> -> vector<1x128xf32>
    %c0_52 = arith.constant 0 : index
    %c0_53 = arith.constant 0 : index
    %299 = vector.load %arg2[%c0_52, %c0_53] : memref<1x128xf32, #tpu.memory_space<vmem>>, vector<1x128xf32>
    tpu.vector_store %arg2[%c0_52, %c0_53], %298 {strides = array<i32>} : memref<1x128xf32, #tpu.memory_space<vmem>>, vector<1x128xf32>,
    return
  }
}

</mosaic_0001>

<bundles_post_ra>
// kernel: tpu_custom_call.1
= control target key start
LH: loop header
LB: loop body
LE: loop exit
PB: predicated region body
PF: predicated region fallthrough
CT: control target
= control target key end

     0   :  { %7 = vsyncpa [#allocation3], 0  ;;  %s2190_s0 = inlined_call_operand.vmem [shape: f32[8,2], index: 0, kind: input, shape index: {}]   ;;  %s2191_s1 = inlined_call_operand.hbm [shape: f32[120,256], index: 1, kind: input, shape index: {}]   ;;  %s2192_s2 = inlined_call_operand.hbm [shape: f32[1,128], index: 2, kind: output, shape index: {}]  }
   0x1   :  { %8 = vsyncpa [#allocation4], 0  ;;  %s1862_s9 = smov [#allocation2]   ;;  %s1814_s13 = scalar_lea.hbm %s2191_s1, 3840 }
   0x2   :  { %s16_s10 = sshll.u32 %s1862_s9, 4  ;;  %p1815_p0 = scmp.ne.s32.totalorder %s2191_s1, %s1814_s13  ;;  %s17_s10 = int_to_ptr.vmem [resolvable:$true] %s16_s10 }
   0x3   :  { %p1818_p1 = scmp.lt.u32.totalorder %s1814_s13, %s2191_s1 }
   0x5   :  { %p1820_p2 = pnand %p1818_p1, %p1815_p0 }
   0x7   :  { %1823 = shalt.err (!%p1820_p2)
}
   0x8   :  { %s1824_s18 = scalar_lea.vmem %s17_s10, 3840  ;;  %p1829_p4 = scmp.lt.s32.totalorder %s17_s10, %s17_s10 }
   0x9   :  { %p1825_p3 = scmp.ne.s32.totalorder %s17_s10, %s1824_s18  ;;  %p1830_p5 = scmp.lt.s32.totalorder %s1824_s18, %s1824_s18 }
   0xb   :  { %p1831_p6 = por %p1830_p5, %p1829_p4 }
   0xd   :  { %p1832_p7 = pnand %p1831_p6, %p1825_p3 }
   0xf   :  { %1835 = shalt.err (!%p1832_p7)
}
  0x10   :  { %s1863_s19 = smov 256   ;;  %s1864_s20 = smov 16  }
  0x11   :  { %22 = dma.hbm_to_vmem [thread:$0]  %s2191_s1, 3840, %s17_s10, [#allocation3], %s1863_s19, %s1863_s19, %s1864_s20  }
  0x12   :  { %1858 = dma.done.wait [#allocation3], 3840  }
  0x13   :  { %1859 = vsyncadd [#allocation3], 4294963456  ;;  %v1865_v0 = vmov 0.0   ;;  %vm1866_vm0 = vmmov 0   ;;  %v26_v1 = vld [vmem:[#allocation2 + $0x90] sm:$0x30]  ;;  %v209_v46 = vlaneseq }
  0x14   :  { %1557 = vmatprep.subr.mxu0 %v1865_v0  ;;  %1559 = vmatprep.mubr.msk.f32.mxu0 %vm1866_vm0, %v1865_v0  ;;  %vm35_vm1 = vcmask 1041408   ;;  %v30_v2 = vrot.slane %v26_v1, 4  ;;  %v28_v3 = vld [vmem:[%s2190_s0] sm:$0xff]  ;;  %vm31_vm2 = vcmask 15360   ;;  %v194_v4 = vld [vmem:[#allocation2 + $0x8] sm:$0xff]  ;;  %v196_v5 = vld [vmem:[#allocation2 + $0x18] sm:$0xff] }
  0x15   :  { %1566 = vmatprep.mubr.msk.f32.mxu1 %vm1866_vm0, %v1865_v0  ;;  %v1910_v6 = vpack.c.bf16 %v196_v5, %v194_v4  ;;  %v193_v7 = vld [vmem:[#allocation2] sm:$0xff]  ;;  %v195_v8 = vld [vmem:[#allocation2 + $0x10] sm:$0xff]  ;;  %v198_v10 = vld [vmem:[#allocation2 + $0x28] sm:$0xff]  ;;  %v1867_v29 = vmov 0.0|0.0   ;;  %vm1868_vm3 = vmmov 1   ;;  %vm115_vm5 = vcmask 80896  }
  0x16   :  { %1558 = vmatpush3.msk.msra.mxu0 %vm35_vm1, %v30_v2  ;;  %v1912_v9 = vpack.c.bf16 %v195_v8, %v193_v7  ;;  %v200_v11 = vld [vmem:[#allocation2 + $0x38] sm:$0xff]  ;;  %v197_v13 = vld [vmem:[#allocation2 + $0x20] sm:$0xff]  ;;  %v199_v14 = vld [vmem:[#allocation2 + $0x30] sm:$0xff]  ;;  %1591 = vmatprep.subr.bf16.mxu1 %v1867_v29  ;;  %v210_v47 = vand.u32 127, %v209_v46  ;;  %s1869_s0 = smov 64   ;;  %s1870_s1 = smov 32  }
  0x17   :  { %1560 = vmatmul.mubr.msk.f32.vlgmr.msra.gmra.mrb[0].mxu0 %vm31_vm2, %v28_v3  ;;  %1596 = vmatprep.subr.bf16.mxu0 %v1910_v6  ;;  %v1916_v12 = vpack.c.bf16 %v200_v11, %v198_v10  ;;  %v1918_v15 = vpack.c.bf16 %v199_v14, %v197_v13  ;;  %v202_v16 = vld [vmem:[#allocation2 + $0x48] sm:$0xff]  ;;  %v204_v17 = vld [vmem:[#allocation2 + $0x58] sm:$0xff]  ;;  %v201_v19 = vld [vmem:[#allocation2 + $0x40] sm:$0xff]  ;;  %s1871_s25 = smov 96   ;;  %vm313_vm9 = vcmask 261120   ;;  %vm220_vm10 = vcmask 523264  }
  0x18   :  { %288 = vmatprep.mubr.f32.mxu0 %v1865_v0  ;;  %1598 = vmatpush1.bf16.msra.mxu0 %v1912_v9  ;;  %v1922_v18 = vpack.c.bf16 %v204_v17, %v202_v16  ;;  %v203_v20 = vld [vmem:[#allocation2 + $0x50] sm:$0xff]  ;;  %v111_v22 = vld [vmem:[#allocation2 + $0x80] sm:$0xff]  ;;  %v206_v24 = vld [vmem:[#allocation2 + $0x68] sm:$0xff]  ;;  %vm214_vm6 = vcmp.ge.s32.totalorder %v210_v47, 64  ;;  %vm216_vm7 = vcmp.lt.s32.totalorder %v210_v47, 96  ;;  %v211_v11 = vadd.s32 128, %v210_v47 }
  0x19   :  { %1600 = vmatprep.subr.bf16.mxu0 %v1916_v12  ;;  %v1924_v21 = vpack.c.bf16 %v203_v20, %v201_v19  ;;  %v112_v23 = vld [vmem:[#allocation2 + $0x90] sm:$0x3]  ;;  %v208_v26 = vld [vmem:[#allocation2 + $0x78] sm:$0xff]  ;;  %v205_v27 = vld [vmem:[#allocation2 + $0x60] sm:$0xff]  ;;  %s1872_s26 = smov [#allocation5]   ;;  %vm1510_vm14 = vcmask 277504  }
  0x1a   :  { %v1592_v25 = vpack.c.bf16 %v112_v23, %v111_v22  ;;  %v207_v28 = vld [vmem:[#allocation2 + $0x70] sm:$0xff]  ;;  %vm1593_vm4 = vmpackc.low %vm35_vm1, %vm1868_vm3  ;;  %v1930_v30 = vpack.c.bf16 %v208_v26, %v206_v24  ;;  %v213_v13 = vand.u32 127, %v211_v11  ;;  %s1519_s27 = sshll.u32 %s1872_s26, 4  ;;  %s1520_s27 = int_to_ptr.vmem [resolvable:$true] %s1519_s27 }
  0x1b   :  { %v1932_v31 = vpack.c.bf16 %v207_v28, %v205_v27  ;;  %v27_v32 = vld [vmem:[#allocation2 + $0x96] ss:$0 sm:$0xff]  ;;  %v113_v41 = vld [vmem:[#allocation2 + $0x92] ss:$0 sm:$0xff]  ;;  %vm1960_vm8 = vmand %vm214_vm6, %vm216_vm7  ;;  %s1836_s28 = scalar_lea.vmem %s1520_s27, 16  ;;  %s1840_s29 = scalar_lea.vmem %s1520_s27, 32 }
  0x1c   :  { %1602 = vmatpush1.bf16.msra.mxu0 %v1918_v15  ;;  %1594 = vmatpush3.bf16.msk.msra.mxu1 %vm1593_vm4, %v1592_v25  ;;  %v1983_v2 = vld [vmem:[#allocation2 + $0x93] ss:$0 sm:$0xff]  ;;  %vm215_vm11 = vcmp.ge.s32.totalorder %v213_v13, 64  ;;  %vm217_vm12 = vcmp.lt.s32.totalorder %v213_v13, 96  ;;  %p1837_p8 = scmp.ne.s32.totalorder %s1520_s27, %s1836_s28  ;;  %p1841_p9 = scmp.lt.s32.totalorder %s1520_s27, %s1520_s27 }
  0x1d   :  { %1604 = vmatprep.subr.bf16.mxu0 %v1922_v18  ;;  %1612 = vmatprep.subr.bf16.mxu1 %v1910_v6  ;;  %v328_v3 = vrot.slane %v1983_v2, 1  ;;  %vm1987_vm13 = vmand %vm215_vm11, %vm217_vm12  ;;  %p1842_p10 = scmp.lt.s32.totalorder %s1840_s29, %s1836_s28 }
  0x1f   :  { %p1843_p11 = por %p1842_p10, %p1841_p9 }
  0x20   :  { %1606 = vmatpush1.bf16.msra.mxu0 %v1924_v21 }
  0x21   :  { %1608 = vmatprep.subr.bf16.mxu0 %v1930_v30  ;;  %p1844_p12 = pnand %p1843_p11, %p1837_p8 }
  0x24   :  { %1610 = vmatpush1.bf16.msra.mxu0 %v1932_v31 }
  0x25   :  { %1628 = vmatprep.subr.bf16.mxu0 %v1910_v6 }
  0x27   :  { %289 = vmatmul.mubr.f32.vlgmr.msra.gmra.mrb[2].mxu0 %v1865_v0 }
  0x28   :  { %1630 = vmatpush1.bf16.msra.mxu0 %v1912_v9  ;;  %530 = vmatprep.mubr.f32.mxu0 %v1865_v0 }
  0x29   :  { %1632 = vmatprep.subr.bf16.mxu0 %v1916_v12 }
  0x2c   :  { %1634 = vmatpush1.bf16.msra.mxu0 %v1918_v15 }
  0x2d   :  { %1636 = vmatprep.subr.bf16.mxu0 %v1922_v18 }
  0x30   :  { %1638 = vmatpush1.bf16.msra.mxu0 %v1924_v21 }
  0x31   :  { %1640 = vmatprep.subr.bf16.mxu0 %v1930_v30 }
  0x34   :  { %1642 = vmatpush1.bf16.msra.mxu0 %v1932_v31 }
  0x35   :  { %1660 = vmatprep.subr.bf16.mxu0 %v1910_v6 }
  0xea   :  { %v104_v33 = vpop.f32.mrb[0].mxu0 }
  0xeb   :  { %v105_v34 = vadd.f32 %v104_v33, %v27_v32  ;;  %v1561_v35 = vpop.f32.mrb[1].mxu0 }
  0xed   :  { %1762 = vtanh.f32 %v105_v34 }
  0xf7   :  { %v1763_v36 = vpop.eup %1762 }
  0xf8   :  { %v109_v37 = vmul.f32 0.5, %v1763_v36 }
  0xfa   :  { %v110_v38 = vadd.f32 0.5, %v109_v37  ;;  %v290_v39 = vpop.f32.mrb[2].mxu0 }
  0xfb   :  { %v292_v40 = vpop.f32.mrb[3].mxu0 }
  0xfc   :  { %1567 = vmatmul.mubr.msk.f32.vlgmr.msra.gmra.mrb[0].mxu1 %vm115_vm5, %v110_v38 }
  0xfd   :  { %1614 = vmatpush1.bf16.msra.mxu1 %v1912_v9  ;;  %398 = vmatprep.mubr.f32.mxu1 %v1865_v0 }
  0xfe   :  { %1616 = vmatprep.subr.bf16.mxu1 %v1916_v12 }
 0x101   :  { %1618 = vmatpush1.bf16.msra.mxu1 %v1918_v15 }
 0x102   :  { %1620 = vmatprep.subr.bf16.mxu1 %v1922_v18 }
 0x105   :  { %1622 = vmatpush1.bf16.msra.mxu1 %v1924_v21 }
 0x106   :  { %1624 = vmatprep.subr.bf16.mxu1 %v1930_v30 }
 0x109   :  { %1626 = vmatpush1.bf16.msra.mxu1 %v1932_v31 }
 0x10a   :  { %1644 = vmatprep.subr.bf16.mxu1 %v1910_v6 }
 0x1cf   :  { %v188_v42 = vpop.f32.mrb[0].mxu1 }
 0x1d0   :  { %v1957_v43 = vadd.f32 %v188_v42, %v113_v41  ;;  %v1568_v44 = vpop.f32.mrb[1].mxu1 }
 0x1d2   :  { %v291_v45 = vadd.f32 %v290_v39, %v1957_v43  ;;  %v327_v4 = vrot.slane %v1957_v43, 1 }
 0x1d4   :  { %1764 = vtanh.f32 %v291_v45 }
 0x1de   :  { %v1765_v48 = vpop.eup %1764 }
 0x1df   :  { %v295_v49 = vmul.f32 0.5, %v1765_v48 }
 0x1e1   :  { %v296_v51 = vadd.f32 0.5, %v295_v49 }
 0x1e3   :  { %v297_v52 = vsel %vm1960_vm8, %v1765_v48, %v296_v51  ;;  %v460_v51 = vrot.slane %v1983_v2, 2 }
 0x1e4   :  { %300 = vrot.lane.b32.xlu0 %v297_v52, %s1869_s0  ;;  %v298_v55 = vmul.f32 0.0, %v297_v52 }
 0x256   :  { %v301_v53 = vpop.permute.xlu0 %300 }
 0x257   :  { %v303_v54 = vmul.f32 %v301_v53, %v297_v52 }
 0x259   :  { %305 = vrot.lane.b32.xlu0 %v303_v54, %s1870_s1 }
 0x2cb   :  { %v306_v56 = vpop.permute.xlu0 %305 }
 0x2cc   :  { %v308_v57 = vadd.f32 %v306_v56, %v298_v55 }
 0x2ce   :  { %310 = vrot.lane.b32.xlu1 %v308_v57, %s1871_s25 }
 0x340   :  { %v311_v58 = vpop.permute.xlu1 %310 }
 0x341   :  { %v314_v59 = vsel %vm313_vm9, %v311_v58, 0.0 }
 0x342   :  { %1766 = vtanh.f32 %v314_v59 }
 0x34c   :  { %v1767_v60 = vpop.eup %1766 }
 0x34d   :  { %317 = vrot.lane.b32.xlu1 %v1767_v60, %s1871_s25 }
 0x3bf   :  { %v318_v61 = vpop.permute.xlu1 %317 }
 0x3c0   :  { %v320_v62 = vmul.f32 %v318_v61, %v297_v52  ;;  %v459_v52 = vrot.slane %v1957_v43, 2 }
 0x3c2   :  { %322 = vrot.lane.b32.xlu0 %v320_v62, %s1870_s1 }
 0x434   :  { %v323_v63 = vpop.permute.xlu0 %322 }
 0x435   :  { %v325_v1 = vsel %vm313_vm9, %v323_v63, 0.0 }
 0x436   :  { %1532 = vmatmul.mubr.msk.f32.vlgmr.msra.gmra.mrb[2].mxu1 %vm220_vm10, %v325_v1 }
 0x437   :  { %1646 = vmatpush1.bf16.msra.mxu1 %v1912_v9  ;;  %662 = vmatprep.mubr.f32.mxu1 %v1865_v0 }
 0x438   :  { %1648 = vmatprep.subr.bf16.mxu1 %v1916_v12 }
 0x43b   :  { %1650 = vmatpush1.bf16.msra.mxu1 %v1918_v15 }
 0x43c   :  { %1652 = vmatprep.subr.bf16.mxu1 %v1922_v18 }
 0x43f   :  { %1654 = vmatpush1.bf16.msra.mxu1 %v1924_v21 }
 0x440   :  { %1656 = vmatprep.subr.bf16.mxu1 %v1930_v30 }
 0x443   :  { %1658 = vmatpush1.bf16.msra.mxu1 %v1932_v31 }
 0x444   :  { %1676 = vmatprep.subr.bf16.mxu1 %v1910_v6 }
 0x509   :  { %v400_v5 = vpop.f32.mrb[2].mxu1 }
 0x50a   :  { %v401_v7 = vadd.f32 %v400_v5, %v327_v4  ;;  %v402_v8 = vpop.f32.mrb[3].mxu1 }
 0x50b   :  { %v403_v10 = vadd.f32 %v402_v8, %v328_v3 }
 0x50c   :  { %1768 = vtanh.f32 %v401_v7 }
 0x50d   :  { %1770 = vtanh.f32 %v403_v10 }
 0x516   :  { %v1769_v14 = vpop.eup %1768 }
 0x517   :  { %v1771_v16 = vpop.eup %1770  ;;  %v407_v17 = vmul.f32 0.5, %v1769_v14 }
 0x518   :  { %v408_v19 = vmul.f32 0.5, %v1771_v16 }
 0x519   :  { %v409_v20 = vadd.f32 0.5, %v407_v17 }
 0x51a   :  { %v410_v23 = vadd.f32 0.5, %v408_v19 }
 0x51b   :  { %v411_v24 = vsel %vm1960_vm8, %v1769_v14, %v409_v20 }
 0x51c   :  { %415 = vrot.lane.b32.xlu1 %v411_v24, %s1869_s0  ;;  %v412_v25 = vsel %vm1987_vm13, %v1771_v16, %v410_v23  ;;  %v413_v33 = vmul.f32 %v411_v24, %v308_v57 }
 0x51d   :  { %426 = vrot.lane.b32.xlu0 %v412_v25, %s1869_s0  ;;  %v424_v37 = vmul.f32 0.0, %v412_v25 }
 0x58e   :  { %v416_v26 = vpop.permute.xlu1 %415 }
 0x58f   :  { %v418_v27 = vmul.f32 %v416_v26, %v411_v24  ;;  %v427_v28 = vpop.permute.xlu0 %426 }
 0x590   :  { %v429_v32 = vmul.f32 %v427_v28, %v412_v25 }
 0x591   :  { %420 = vrot.lane.b32.xlu1 %v418_v27, %s1870_s1 }
 0x592   :  { %431 = vrot.lane.b32.xlu0 %v429_v32, %s1870_s1 }
 0x603   :  { %v421_v34 = vpop.permute.xlu1 %420 }
 0x604   :  { %v423_v35 = vadd.f32 %v421_v34, %v413_v33  ;;  %v432_v36 = vpop.permute.xlu0 %431  ;;  %v592_v33 = vrot.slane %v1983_v2, 3  ;;  %v591_v34 = vrot.slane %v1957_v43, 3 }
 0x605   :  { %v434_v38 = vadd.f32 %v432_v36, %v424_v37 }
 0x606   :  { %436 = vrot.lane.b32.xlu1 %v423_v35, %s1871_s25 }
 0x678   :  { %v437_v39 = vpop.permute.xlu1 %436 }
 0x679   :  { %v439_v40 = vsel %vm313_vm9, %v437_v39, %v434_v38 }
 0x67a   :  { %1772 = vtanh.f32 %v439_v40 }
 0x684   :  { %v1773_v41 = vpop.eup %1772 }
 0x685   :  { %446 = vrot.lane.b32.xlu1 %v1773_v41, %s1869_s0  ;;  %442 = vrot.lane.b32.xlu0 %v1773_v41, %s1871_s25 }
 0x6f7   :  { %v447_v42 = vpop.permute.xlu1 %446  ;;  %v443_v44 = vpop.permute.xlu0 %442 }
 0x6f8   :  { %v449_v45 = vmul.f32 %v447_v42, %v412_v25  ;;  %v445_v46 = vmul.f32 %v443_v44, %v411_v24 }
 0x6fa   :  { %455 = vrot.lane.b32.xlu1 %v449_v45, %s1869_s0  ;;  %451 = vrot.lane.b32.xlu0 %v445_v46, %s1870_s1 }
 0x76c   :  { %v456_v47 = vpop.permute.xlu1 %455  ;;  %v452_v48 = vpop.permute.xlu0 %451 }
 0x76d   :  { %v458_v49 = vsel %vm313_vm9, %v452_v48, %v456_v47 }
 0x76e   :  { %1533 = vmatmul.mubr.msk.f32.vlgmr.msra.gmra.mrb[4].mxu0 %vm220_vm10, %v458_v49 }
 0x76f   :  { %1662 = vmatpush1.bf16.msra.mxu0 %v1912_v9  ;;  %794 = vmatprep.mubr.f32.mxu0 %v1865_v0 }
 0x770   :  { %1664 = vmatprep.subr.bf16.mxu0 %v1916_v12 }
 0x773   :  { %1666 = vmatpush1.bf16.msra.mxu0 %v1918_v15 }
 0x774   :  { %1668 = vmatprep.subr.bf16.mxu0 %v1922_v18 }
 0x777   :  { %1670 = vmatpush1.bf16.msra.mxu0 %v1924_v21 }
 0x778   :  { %1672 = vmatprep.subr.bf16.mxu0 %v1930_v30 }
 0x77b   :  { %1674 = vmatpush1.bf16.msra.mxu0 %v1932_v31 }
 0x77c   :  { %1692 = vmatprep.subr.bf16.mxu0 %v1910_v6 }
 0x841   :  { %v532_v53 = vpop.f32.mrb[4].mxu0 }
 0x842   :  { %v533_v54 = vadd.f32 %v532_v53, %v459_v52  ;;  %v534_v55 = vpop.f32.mrb[5].mxu0 }
 0x843   :  { %v535_v56 = vadd.f32 %v534_v55, %v460_v51 }
 0x844   :  { %1774 = vtanh.f32 %v533_v54 }
 0x845   :  { %1776 = vtanh.f32 %v535_v56 }
 0x84e   :  { %v1775_v57 = vpop.eup %1774 }
 0x84f   :  { %v1777_v58 = vpop.eup %1776  ;;  %v539_v59 = vmul.f32 0.5, %v1775_v57 }
 0x850   :  { %v540_v60 = vmul.f32 0.5, %v1777_v58 }
 0x851   :  { %v541_v61 = vadd.f32 0.5, %v539_v59 }
 0x852   :  { %v542_v62 = vadd.f32 0.5, %v540_v60 }
 0x853   :  { %v543_v63 = vsel %vm1960_vm8, %v1775_v57, %v541_v61 }
 0x854   :  { %547 = vrot.lane.b32.xlu0 %v543_v63, %s1869_s0  ;;  %v544_v1 = vsel %vm1987_vm13, %v1777_v58, %v542_v62  ;;  %v545_v8 = vmul.f32 %v543_v63, %v423_v35 }
 0x855   :  { %558 = vrot.lane.b32.xlu1 %v544_v1, %s1869_s0  ;;  %v556_v14 = vmul.f32 %v544_v1, %v434_v38 }
 0x8c6   :  { %v548_v3 = vpop.permute.xlu0 %547 }
 0x8c7   :  { %v550_v4 = vmul.f32 %v548_v3, %v543_v63  ;;  %v559_v5 = vpop.permute.xlu1 %558 }
 0x8c8   :  { %v561_v7 = vmul.f32 %v559_v5, %v544_v1 }
 0x8c9   :  { %552 = vrot.lane.b32.xlu0 %v550_v4, %s1870_s1 }
 0x8ca   :  { %563 = vrot.lane.b32.xlu1 %v561_v7, %s1870_s1 }
 0x93b   :  { %v553_v10 = vpop.permute.xlu0 %552 }
 0x93c   :  { %v555_v11 = vadd.f32 %v553_v10, %v545_v8  ;;  %v564_v13 = vpop.permute.xlu1 %563  ;;  %v724_v8 = vrot.slane %v1983_v2, 4  ;;  %v723_v10 = vrot.slane %v1957_v43, 4 }
 0x93d   :  { %v566_v16 = vadd.f32 %v564_v13, %v556_v14 }
 0x93e   :  { %568 = vrot.lane.b32.xlu0 %v555_v11, %s1871_s25 }
 0x9b0   :  { %v569_v17 = vpop.permute.xlu0 %568 }
 0x9b1   :  { %v571_v19 = vsel %vm313_vm9, %v569_v17, %v566_v16 }
 0x9b2   :  { %1778 = vtanh.f32 %v571_v19 }
 0x9bc   :  { %v1779_v20 = vpop.eup %1778 }
 0x9bd   :  { %578 = vrot.lane.b32.xlu0 %v1779_v20, %s1869_s0  ;;  %574 = vrot.lane.b32.xlu1 %v1779_v20, %s1871_s25 }
 0xa2f   :  { %v579_v23 = vpop.permute.xlu0 %578  ;;  %v575_v24 = vpop.permute.xlu1 %574 }
 0xa30   :  { %v581_v25 = vmul.f32 %v579_v23, %v544_v1  ;;  %v577_v26 = vmul.f32 %v575_v24, %v543_v63 }
 0xa32   :  { %587 = vrot.lane.b32.xlu0 %v581_v25, %s1869_s0  ;;  %583 = vrot.lane.b32.xlu1 %v577_v26, %s1870_s1 }
 0xaa4   :  { %v588_v27 = vpop.permute.xlu0 %587  ;;  %v584_v28 = vpop.permute.xlu1 %583 }
 0xaa5   :  { %v590_v32 = vsel %vm313_vm9, %v584_v28, %v588_v27 }
 0xaa6   :  { %1534 = vmatmul.mubr.msk.f32.vlgmr.msra.gmra.mrb[4].mxu1 %vm220_vm10, %v590_v32 }
 0xaa7   :  { %1678 = vmatpush1.bf16.msra.mxu1 %v1912_v9  ;;  %926 = vmatprep.mubr.f32.mxu1 %v1865_v0 }
 0xaa8   :  { %1680 = vmatprep.subr.bf16.mxu1 %v1916_v12 }
 0xaab   :  { %1682 = vmatpush1.bf16.msra.mxu1 %v1918_v15 }
 0xaac   :  { %1684 = vmatprep.subr.bf16.mxu1 %v1922_v18 }
 0xaaf   :  { %1686 = vmatpush1.bf16.msra.mxu1 %v1924_v21 }
 0xab0   :  { %1688 = vmatprep.subr.bf16.mxu1 %v1930_v30 }
 0xab3   :  { %1690 = vmatpush1.bf16.msra.mxu1 %v1932_v31 }
 0xab4   :  { %1708 = vmatprep.subr.bf16.mxu1 %v1910_v6 }
 0xb79   :  { %v664_v35 = vpop.f32.mrb[4].mxu1 }
 0xb7a   :  { %v665_v36 = vadd.f32 %v664_v35, %v591_v34  ;;  %v666_v37 = vpop.f32.mrb[5].mxu1 }
 0xb7b   :  { %v667_v38 = vadd.f32 %v666_v37, %v592_v33 }
 0xb7c   :  { %1780 = vtanh.f32 %v665_v36 }
 0xb7d   :  { %1782 = vtanh.f32 %v667_v38 }
 0xb86   :  { %v1781_v39 = vpop.eup %1780 }
 0xb87   :  { %v1783_v40 = vpop.eup %1782  ;;  %v671_v41 = vmul.f32 0.5, %v1781_v39 }
 0xb88   :  { %v672_v42 = vmul.f32 0.5, %v1783_v40 }
 0xb89   :  { %v673_v44 = vadd.f32 0.5, %v671_v41 }
 0xb8a   :  { %v674_v45 = vadd.f32 0.5, %v672_v42 }
 0xb8b   :  { %v675_v46 = vsel %vm1960_vm8, %v1781_v39, %v673_v44 }
 0xb8c   :  { %679 = vrot.lane.b32.xlu1 %v675_v46, %s1869_s0  ;;  %v676_v47 = vsel %vm1987_vm13, %v1783_v40, %v674_v45  ;;  %v677_v53 = vmul.f32 %v675_v46, %v555_v11 }
 0xb8d   :  { %690 = vrot.lane.b32.xlu0 %v676_v47, %s1869_s0  ;;  %v688_v57 = vmul.f32 %v676_v47, %v566_v16 }
 0xbfe   :  { %v680_v48 = vpop.permute.xlu1 %679 }
 0xbff   :  { %v682_v49 = vmul.f32 %v680_v48, %v675_v46  ;;  %v691_v51 = vpop.permute.xlu0 %690 }
 0xc00   :  { %v693_v52 = vmul.f32 %v691_v51, %v676_v47 }
 0xc01   :  { %684 = vrot.lane.b32.xlu1 %v682_v49, %s1870_s1 }
 0xc02   :  { %695 = vrot.lane.b32.xlu0 %v693_v52, %s1870_s1  ;;  %v856_v52 = vrot.slane %v1983_v2, 5 }
 0xc73   :  { %v685_v54 = vpop.permute.xlu1 %684 }
 0xc74   :  { %v687_v55 = vadd.f32 %v685_v54, %v677_v53  ;;  %v696_v56 = vpop.permute.xlu0 %695  ;;  %v855_v53 = vrot.slane %v1957_v43, 5 }
 0xc75   :  { %v698_v58 = vadd.f32 %v696_v56, %v688_v57 }
 0xc76   :  { %700 = vrot.lane.b32.xlu1 %v687_v55, %s1871_s25 }
 0xce8   :  { %v701_v59 = vpop.permute.xlu1 %700 }
 0xce9   :  { %v703_v60 = vsel %vm313_vm9, %v701_v59, %v698_v58 }
 0xcea   :  { %1784 = vtanh.f32 %v703_v60 }
 0xcf4   :  { %v1785_v61 = vpop.eup %1784 }
 0xcf5   :  { %710 = vrot.lane.b32.xlu1 %v1785_v61, %s1869_s0  ;;  %706 = vrot.lane.b32.xlu0 %v1785_v61, %s1871_s25 }
 0xd67   :  { %v711_v62 = vpop.permute.xlu1 %710  ;;  %v707_v63 = vpop.permute.xlu0 %706 }
 0xd68   :  { %v713_v1 = vmul.f32 %v711_v62, %v676_v47  ;;  %v709_v3 = vmul.f32 %v707_v63, %v675_v46 }
 0xd6a   :  { %719 = vrot.lane.b32.xlu1 %v713_v1, %s1869_s0  ;;  %715 = vrot.lane.b32.xlu0 %v709_v3, %s1870_s1 }
 0xddc   :  { %v720_v4 = vpop.permute.xlu1 %719  ;;  %v716_v5 = vpop.permute.xlu0 %715 }
 0xddd   :  { %v722_v7 = vsel %vm313_vm9, %v716_v5, %v720_v4 }
 0xdde   :  { %1535 = vmatmul.mubr.msk.f32.vlgmr.msra.gmra.mrb[6].mxu0 %vm220_vm10, %v722_v7 }
 0xddf   :  { %1694 = vmatpush1.bf16.msra.mxu0 %v1912_v9  ;;  %1058 = vmatprep.mubr.f32.mxu0 %v1865_v0 }
 0xde0   :  { %1696 = vmatprep.subr.bf16.mxu0 %v1916_v12 }
 0xde3   :  { %1698 = vmatpush1.bf16.msra.mxu0 %v1918_v15 }
 0xde4   :  { %1700 = vmatprep.subr.bf16.mxu0 %v1922_v18 }
 0xde7   :  { %1702 = vmatpush1.bf16.msra.mxu0 %v1924_v21 }
 0xde8   :  { %1704 = vmatprep.subr.bf16.mxu0 %v1930_v30 }
 0xdeb   :  { %1706 = vmatpush1.bf16.msra.mxu0 %v1932_v31 }
 0xdec   :  { %1724 = vmatprep.subr.bf16.mxu0 %v1910_v6 }
 0xeb1   :  { %v796_v11 = vpop.f32.mrb[6].mxu0 }
 0xeb2   :  { %v797_v13 = vadd.f32 %v796_v11, %v723_v10  ;;  %v798_v14 = vpop.f32.mrb[7].mxu0 }
 0xeb3   :  { %v799_v16 = vadd.f32 %v798_v14, %v724_v8 }
 0xeb4   :  { %1786 = vtanh.f32 %v797_v13 }
 0xeb5   :  { %1788 = vtanh.f32 %v799_v16 }
 0xebe   :  { %v1787_v17 = vpop.eup %1786 }
 0xebf   :  { %v1789_v19 = vpop.eup %1788  ;;  %v803_v20 = vmul.f32 0.5, %v1787_v17 }
 0xec0   :  { %v804_v23 = vmul.f32 0.5, %v1789_v19 }
 0xec1   :  { %v805_v24 = vadd.f32 0.5, %v803_v20 }
 0xec2   :  { %v806_v25 = vadd.f32 0.5, %v804_v23 }
 0xec3   :  { %v807_v26 = vsel %vm1960_vm8, %v1787_v17, %v805_v24 }
 0xec4   :  { %811 = vrot.lane.b32.xlu0 %v807_v26, %s1869_s0  ;;  %v808_v6 = vsel %vm1987_vm13, %v1789_v19, %v806_v25  ;;  %v809_v34 = vmul.f32 %v807_v26, %v687_v55 }
 0xec5   :  { %822 = vrot.lane.b32.xlu1 %v808_v6, %s1869_s0  ;;  %v820_v38 = vmul.f32 %v808_v6, %v698_v58 }
 0xf36   :  { %v812_v27 = vpop.permute.xlu0 %811 }
 0xf37   :  { %v814_v28 = vmul.f32 %v812_v27, %v807_v26  ;;  %v823_v32 = vpop.permute.xlu1 %822 }
 0xf38   :  { %v825_v33 = vmul.f32 %v823_v32, %v808_v6 }
 0xf39   :  { %816 = vrot.lane.b32.xlu0 %v814_v28, %s1870_s1 }
 0xf3a   :  { %827 = vrot.lane.b32.xlu1 %v825_v33, %s1870_s1  ;;  %v988_v33 = vrot.slane %v1983_v2, 6 }
 0xfab   :  { %v817_v35 = vpop.permute.xlu0 %816 }
 0xfac   :  { %v819_v36 = vadd.f32 %v817_v35, %v809_v34  ;;  %v828_v37 = vpop.permute.xlu1 %827  ;;  %v987_v34 = vrot.slane %v1957_v43, 6 }
 0xfad   :  { %v830_v39 = vadd.f32 %v828_v37, %v820_v38 }
 0xfae   :  { %832 = vrot.lane.b32.xlu0 %v819_v36, %s1871_s25 }
0x1020   :  { %v833_v40 = vpop.permute.xlu0 %832 }
0x1021   :  { %v835_v41 = vsel %vm313_vm9, %v833_v40, %v830_v39 }
0x1022   :  { %1790 = vtanh.f32 %v835_v41 }
0x102c   :  { %v1791_v42 = vpop.eup %1790 }
0x102d   :  { %842 = vrot.lane.b32.xlu0 %v1791_v42, %s1869_s0  ;;  %838 = vrot.lane.b32.xlu1 %v1791_v42, %s1871_s25 }
0x109f   :  { %v843_v44 = vpop.permute.xlu0 %842  ;;  %v839_v45 = vpop.permute.xlu1 %838 }
0x10a0   :  { %v845_v46 = vmul.f32 %v843_v44, %v808_v6  ;;  %v841_v47 = vmul.f32 %v839_v45, %v807_v26 }
0x10a2   :  { %851 = vrot.lane.b32.xlu0 %v845_v46, %s1869_s0  ;;  %847 = vrot.lane.b32.xlu1 %v841_v47, %s1870_s1 }
0x1114   :  { %v852_v48 = vpop.permute.xlu0 %851  ;;  %v848_v49 = vpop.permute.xlu1 %847 }
0x1115   :  { %v854_v51 = vsel %vm313_vm9, %v848_v49, %v852_v48 }
0x1116   :  { %1536 = vmatmul.mubr.msk.f32.vlgmr.msra.gmra.mrb[6].mxu1 %vm220_vm10, %v854_v51 }
0x1117   :  { %1710 = vmatpush1.bf16.msra.mxu1 %v1912_v9  ;;  %1190 = vmatprep.mubr.f32.mxu1 %v1865_v0 }
0x1118   :  { %1712 = vmatprep.subr.bf16.mxu1 %v1916_v12 }
0x111b   :  { %1714 = vmatpush1.bf16.msra.mxu1 %v1918_v15 }
0x111c   :  { %1716 = vmatprep.subr.bf16.mxu1 %v1922_v18 }
0x111f   :  { %1718 = vmatpush1.bf16.msra.mxu1 %v1924_v21 }
0x1120   :  { %1720 = vmatprep.subr.bf16.mxu1 %v1930_v30 }
0x1123   :  { %1722 = vmatpush1.bf16.msra.mxu1 %v1932_v31 }
0x1124   :  { %1739 = vmatprep.subr.bf16.mxu1 %v1867_v29 }
0x11e9   :  { %v928_v54 = vpop.f32.mrb[6].mxu1 }
0x11ea   :  { %v929_v55 = vadd.f32 %v928_v54, %v855_v53  ;;  %v930_v56 = vpop.f32.mrb[7].mxu1 }
0x11eb   :  { %v931_v57 = vadd.f32 %v930_v56, %v856_v52 }
0x11ec   :  { %1792 = vtanh.f32 %v929_v55 }
0x11ed   :  { %1794 = vtanh.f32 %v931_v57 }
0x11f6   :  { %v1793_v58 = vpop.eup %1792 }
0x11f7   :  { %v1795_v59 = vpop.eup %1794  ;;  %v935_v60 = vmul.f32 0.5, %v1793_v58 }
0x11f8   :  { %v936_v61 = vmul.f32 0.5, %v1795_v59 }
0x11f9   :  { %v937_v62 = vadd.f32 0.5, %v935_v60 }
0x11fa   :  { %v938_v63 = vadd.f32 0.5, %v936_v61 }
0x11fb   :  { %v939_v1 = vsel %vm1960_vm8, %v1793_v58, %v937_v62  ;;  %v1120_v62 = vrot.slane %v1983_v2, 7 }
0x11fc   :  { %943 = vrot.lane.b32.xlu1 %v939_v1, %s1869_s0  ;;  %v940_v3 = vsel %vm1987_vm13, %v1795_v59, %v938_v63  ;;  %v941_v10 = vmul.f32 %v939_v1, %v819_v36  ;;  %v1119_v63 = vrot.slane %v1957_v43, 7 }
0x11fd   :  { %954 = vrot.lane.b32.xlu0 %v940_v3, %s1869_s0  ;;  %v952_v16 = vmul.f32 %v940_v3, %v830_v39 }
0x126e   :  { %v944_v4 = vpop.permute.xlu1 %943 }
0x126f   :  { %v946_v5 = vmul.f32 %v944_v4, %v939_v1  ;;  %v955_v7 = vpop.permute.xlu0 %954 }
0x1270   :  { %v957_v8 = vmul.f32 %v955_v7, %v940_v3 }
0x1271   :  { %948 = vrot.lane.b32.xlu1 %v946_v5, %s1870_s1 }
0x1272   :  { %959 = vrot.lane.b32.xlu0 %v957_v8, %s1870_s1 }
0x12e3   :  { %v949_v11 = vpop.permute.xlu1 %948 }
0x12e4   :  { %v951_v13 = vadd.f32 %v949_v11, %v941_v10  ;;  %v960_v14 = vpop.permute.xlu0 %959 }
0x12e5   :  { %v962_v17 = vadd.f32 %v960_v14, %v952_v16 }
0x12e6   :  { %964 = vrot.lane.b32.xlu1 %v951_v13, %s1871_s25 }
0x1358   :  { %v965_v19 = vpop.permute.xlu1 %964 }
0x1359   :  { %v967_v20 = vsel %vm313_vm9, %v965_v19, %v962_v17 }
0x135a   :  { %1796 = vtanh.f32 %v967_v20 }
0x1364   :  { %v1797_v23 = vpop.eup %1796 }
0x1365   :  { %974 = vrot.lane.b32.xlu1 %v1797_v23, %s1869_s0  ;;  %970 = vrot.lane.b32.xlu0 %v1797_v23, %s1871_s25 }
0x13d7   :  { %v975_v24 = vpop.permute.xlu1 %974  ;;  %v971_v25 = vpop.permute.xlu0 %970 }
0x13d8   :  { %v977_v26 = vmul.f32 %v975_v24, %v940_v3  ;;  %v973_v6 = vmul.f32 %v971_v25, %v939_v1 }
0x13da   :  { %983 = vrot.lane.b32.xlu1 %v977_v26, %s1869_s0  ;;  %979 = vrot.lane.b32.xlu0 %v973_v6, %s1870_s1 }
0x144c   :  { %v984_v27 = vpop.permute.xlu1 %983  ;;  %v980_v28 = vpop.permute.xlu0 %979 }
0x144d   :  { %v986_v32 = vsel %vm313_vm9, %v980_v28, %v984_v27 }
0x144e   :  { %1537 = vmatmul.mubr.msk.f32.vlgmr.msra.gmra.mrb[8].mxu0 %vm220_vm10, %v986_v32 }
0x144f   :  { %1726 = vmatpush1.bf16.msra.mxu0 %v1912_v9  ;;  %1318 = vmatprep.mubr.f32.mxu0 %v1865_v0 }
0x1450   :  { %1728 = vmatprep.subr.bf16.mxu0 %v1916_v12 }
0x1453   :  { %1730 = vmatpush1.bf16.msra.mxu0 %v1918_v15 }
0x1454   :  { %1732 = vmatprep.subr.bf16.mxu0 %v1922_v18 }
0x1457   :  { %1734 = vmatpush1.bf16.msra.mxu0 %v1924_v21 }
0x1458   :  { %1736 = vmatprep.subr.bf16.mxu0 %v1930_v30 }
0x145b   :  { %1738 = vmatpush1.bf16.msra.mxu0 %v1932_v31 }
0x1521   :  { %v1060_v35 = vpop.f32.mrb[8].mxu0 }
0x1522   :  { %v1061_v9 = vadd.f32 %v1060_v35, %v987_v34  ;;  %v1062_v36 = vpop.f32.mrb[9].mxu0 }
0x1523   :  { %v1063_v37 = vadd.f32 %v1062_v36, %v988_v33 }
0x1524   :  { %1798 = vtanh.f32 %v1061_v9 }
0x1525   :  { %1800 = vtanh.f32 %v1063_v37 }
0x152e   :  { %v1799_v12 = vpop.eup %1798 }
0x152f   :  { %v1801_v15 = vpop.eup %1800  ;;  %v1067_v38 = vmul.f32 0.5, %v1799_v12 }
0x1530   :  { %v1068_v18 = vmul.f32 0.5, %v1801_v15 }
0x1531   :  { %v1069_v39 = vadd.f32 0.5, %v1067_v38 }
0x1532   :  { %v1070_v21 = vadd.f32 0.5, %v1068_v18 }
0x1533   :  { %v1071_v30 = vsel %vm1960_vm8, %v1799_v12, %v1069_v39 }
0x1534   :  { %1075 = vrot.lane.b32.xlu0 %v1071_v30, %s1869_s0  ;;  %v1072_v31 = vsel %vm1987_vm13, %v1801_v15, %v1070_v21  ;;  %v1073_v45 = vmul.f32 %v1071_v30, %v951_v13 }
0x1535   :  { %1086 = vrot.lane.b32.xlu1 %v1072_v31, %s1869_s0  ;;  %v1084_v49 = vmul.f32 %v1072_v31, %v962_v17 }
0x15a6   :  { %v1076_v40 = vpop.permute.xlu0 %1075 }
0x15a7   :  { %v1078_v41 = vmul.f32 %v1076_v40, %v1071_v30  ;;  %v1087_v42 = vpop.permute.xlu1 %1086 }
0x15a8   :  { %v1089_v44 = vmul.f32 %v1087_v42, %v1072_v31 }
0x15a9   :  { %1080 = vrot.lane.b32.xlu0 %v1078_v41, %s1870_s1 }
0x15aa   :  { %1091 = vrot.lane.b32.xlu1 %v1089_v44, %s1870_s1 }
0x161b   :  { %v1081_v46 = vpop.permute.xlu0 %1080 }
0x161c   :  { %v1083_v47 = vadd.f32 %v1081_v46, %v1073_v45  ;;  %v1092_v48 = vpop.permute.xlu1 %1091 }
0x161d   :  { %v1094_v51 = vadd.f32 %v1092_v48, %v1084_v49  ;;  %v1347_v48 = vld [vmem:[#allocation2 + $0xb0] sm:$0xff]  ;;  %v1348_v49 = vld [vmem:[#allocation2 + $0xc0] sm:$0xff] }
0x161e   :  { %1096 = vrot.lane.b32.xlu0 %v1083_v47, %s1871_s25 }
0x1690   :  { %v1097_v52 = vpop.permute.xlu0 %1096 }
0x1691   :  { %v1099_v53 = vsel %vm313_vm9, %v1097_v52, %v1094_v51  ;;  %v1349_v52 = vld [vmem:[#allocation2 + $0xd0] sm:$0xff] }
0x1692   :  { %1802 = vtanh.f32 %v1099_v53  ;;  %v1743_v22 = vpack.c.bf16 %v1349_v52, %v1348_v49 }
0x169c   :  { %v1803_v54 = vpop.eup %1802 }
0x169d   :  { %1106 = vrot.lane.b32.xlu0 %v1803_v54, %s1869_s0  ;;  %1102 = vrot.lane.b32.xlu1 %v1803_v54, %s1871_s25 }
0x170f   :  { %v1107_v55 = vpop.permute.xlu0 %1106  ;;  %v1103_v56 = vpop.permute.xlu1 %1102 }
0x1710   :  { %v1109_v57 = vmul.f32 %v1107_v55, %v1072_v31  ;;  %v1105_v58 = vmul.f32 %v1103_v56, %v1071_v30  ;;  %v1350_v56 = vld [vmem:[#allocation2 + $0xa8] sm:$0xff] }
0x1712   :  { %1115 = vrot.lane.b32.xlu0 %v1109_v57, %s1869_s0  ;;  %1111 = vrot.lane.b32.xlu1 %v1105_v58, %s1870_s1  ;;  %v1351_v57 = vld [vmem:[#allocation2 + $0xb8] sm:$0xff] }
0x1713   :  { %v1746_v58 = vpack.c.bf16 %v1351_v57, %v1350_v56 }
0x1784   :  { %v1116_v59 = vpop.permute.xlu0 %1115  ;;  %v1112_v60 = vpop.permute.xlu1 %1111 }
0x1785   :  { %v1118_v61 = vsel %vm313_vm9, %v1112_v60, %v1116_v59  ;;  %v1352_v60 = vld [vmem:[#allocation2 + $0xc8] sm:$0xff] }
0x1786   :  { %1538 = vmatmul.mubr.msk.f32.vlgmr.msra.gmra.mrb[8].mxu1 %vm220_vm10, %v1118_v61  ;;  %v1353_v61 = vld [vmem:[#allocation2 + $0xd8] sm:$0xff] }
0x1787   :  { %1577 = vmatprep.mubr.msk.f32.mxu1 %vm1866_vm0, %v1865_v0 }
0x1859   :  { %v1192_v1 = vpop.f32.mrb[8].mxu1 }
0x185a   :  { %v1193_v3 = vadd.f32 %v1192_v1, %v1119_v63  ;;  %v1194_v4 = vpop.f32.mrb[9].mxu1  ;;  %v1354_v63 = vld [vmem:[#allocation2 + $0xe0] ss:$0 sm:$0xff] }
0x185b   :  { %v1195_v5 = vadd.f32 %v1194_v4, %v1120_v62  ;;  %v1749_v62 = vpack.c.bf16 %v1353_v61, %v1352_v60 }
0x185c   :  { %1804 = vtanh.f32 %v1193_v3 }
0x185d   :  { %1806 = vtanh.f32 %v1195_v5 }
0x1866   :  { %v1805_v7 = vpop.eup %1804 }
0x1867   :  { %v1807_v8 = vpop.eup %1806  ;;  %v1199_v10 = vmul.f32 0.5, %v1805_v7 }
0x1868   :  { %v1200_v11 = vmul.f32 0.5, %v1807_v8 }
0x1869   :  { %v1201_v13 = vadd.f32 0.5, %v1199_v10 }
0x186a   :  { %v1202_v14 = vadd.f32 0.5, %v1200_v11 }
0x186b   :  { %v1203_v16 = vsel %vm1960_vm8, %v1805_v7, %v1201_v13  ;;  %v1355_v7 = vld [vmem:[#allocation2 + $0xe8] ss:$0 sm:$0xff] }
0x186c   :  { %1207 = vrot.lane.b32.xlu1 %v1203_v16, %s1869_s0  ;;  %v1204_v43 = vsel %vm1987_vm13, %v1807_v8, %v1202_v14  ;;  %v1205_v24 = vmul.f32 %v1203_v16, %v1083_v47 }
0x186d   :  { %1218 = vrot.lane.b32.xlu0 %v1204_v43, %s1869_s0  ;;  %v1216_v6 = vmul.f32 %v1204_v43, %v1094_v51 }
0x18de   :  { %v1208_v17 = vpop.permute.xlu1 %1207 }
0x18df   :  { %v1210_v19 = vmul.f32 %v1208_v17, %v1203_v16  ;;  %v1219_v20 = vpop.permute.xlu0 %1218 }
0x18e0   :  { %v1221_v23 = vmul.f32 %v1219_v20, %v1204_v43 }
0x18e1   :  { %1212 = vrot.lane.b32.xlu1 %v1210_v19, %s1870_s1 }
0x18e2   :  { %1223 = vrot.lane.b32.xlu0 %v1221_v23, %s1870_s1 }
0x1953   :  { %v1213_v25 = vpop.permute.xlu1 %1212 }
0x1954   :  { %v1215_v26 = vadd.f32 %v1213_v25, %v1205_v24  ;;  %v1224_v50 = vpop.permute.xlu0 %1223 }
0x1955   :  { %v1226_v27 = vadd.f32 %v1224_v50, %v1216_v6 }
0x1956   :  { %1228 = vrot.lane.b32.xlu1 %v1215_v26, %s1871_s25 }
0x19c8   :  { %v1229_v28 = vpop.permute.xlu1 %1228 }
0x19c9   :  { %v1231_v32 = vsel %vm313_vm9, %v1229_v28, %v1226_v27 }
0x19ca   :  { %1808 = vtanh.f32 %v1231_v32 }
0x19d4   :  { %v1809_v33 = vpop.eup %1808 }
0x19d5   :  { %1238 = vrot.lane.b32.xlu1 %v1809_v33, %s1869_s0  ;;  %1234 = vrot.lane.b32.xlu0 %v1809_v33, %s1871_s25 }
0x1a47   :  { %v1239_v34 = vpop.permute.xlu1 %1238  ;;  %v1235_v35 = vpop.permute.xlu0 %1234 }
0x1a48   :  { %v1241_v9 = vmul.f32 %v1239_v34, %v1204_v43  ;;  %v1237_v36 = vmul.f32 %v1235_v35, %v1203_v16 }
0x1a4a   :  { %1247 = vrot.lane.b32.xlu1 %v1241_v9, %s1869_s0  ;;  %1243 = vrot.lane.b32.xlu0 %v1237_v36, %s1870_s1 }
0x1abc   :  { %v1248_v37 = vpop.permute.xlu1 %1247  ;;  %v1244_v12 = vpop.permute.xlu0 %1243 }
0x1abd   :  { %v1250_v15 = vsel %vm313_vm9, %v1244_v12, %v1248_v37 }
0x1abe   :  { %1539 = vmatmul.mubr.msk.f32.vlgmr.msra.gmra.mrb[10].mxu0 %vm220_vm10, %v1250_v15 }
0x1b91   :  { %v1320_v38 = vpop.f32.mrb[10].mxu0 }
0x1b92   :  { %v1321_v18 = vpop.f32.mrb[11].mxu0 }
0x1b93   :  { %v1322_v39 = vadd.f32 %v1321_v18, %v1983_v2  ;;  %v1346_v2 = vld [vmem:[#allocation2 + $0xa0] sm:$0xff] }
0x1b94   :  { %v1740_v51 = vpack.c.bf16 %v1347_v48, %v1346_v2 }
0x1b95   :  { %1810 = vtanh.f32 %v1322_v39 }
0x1b96   :  { %1741 = vmatpush3.bf16.msra.mxu1 %v1740_v51 }
0x1b97   :  { %1742 = vmatprep.subr.bf16.mxu1 %v1867_v29 }
0x1b9a   :  { %1744 = vmatpush3.bf16.msra.mxu1 %v1743_v22 }
0x1b9b   :  { %1745 = vmatprep.subr.bf16.mxu1 %v1867_v29 }
0x1b9f   :  { %v1811_v21 = vpop.eup %1810 }
0x1ba0   :  { %v1325_v30 = vmul.f32 0.5, %v1811_v21 }
0x1ba2   :  { %v1326_v31 = vadd.f32 0.5, %v1325_v30 }
0x1ba4   :  { %v1327_v40 = vsel %vm1987_vm13, %v1811_v21, %v1326_v31 }
0x1ba5   :  { %1330 = vrot.lane.b32.xlu0 %v1327_v40, %s1869_s0  ;;  %v1328_v44 = vmul.f32 %v1327_v40, %v1226_v27 }
0x1c17   :  { %v1331_v41 = vpop.permute.xlu0 %1330 }
0x1c18   :  { %v1333_v42 = vmul.f32 %v1331_v41, %v1327_v40 }
0x1c1a   :  { %1335 = vrot.lane.b32.xlu1 %v1333_v42, %s1870_s1 }
0x1c8c   :  { %v1336_v45 = vpop.permute.xlu1 %1335 }
0x1c8d   :  { %v1338_v46 = vadd.f32 %v1336_v45, %v1328_v44 }
0x1c8f   :  { %v1339_v47 = vsel %vm313_vm9, %v1229_v28, %v1338_v46 }
0x1c90   :  { %1812 = vtanh.f32 %v1339_v47 }
0x1c9a   :  { %v1813_v53 = vpop.eup %1812 }
0x1c9b   :  { %1342 = vrot.lane.b32.xlu0 %v1813_v53, %s1869_s0 }
0x1d0d   :  { %v1343_v54 = vpop.permute.xlu0 %1342 }
0x1d0e   :  { %v1345_v55 = vmul.f32 %v1343_v54, %v1327_v40 }
0x1d10   :  { %1357 = vrot.lane.b32.xlu1 %v1345_v55, %s1870_s1 }
0x1d82   :  { %v1358_v59 = vpop.permute.xlu1 %1357 }
0x1d83   :  { %1578 = vmatmul.mubr.msk.f32.vlgmr.msra.gmra.mrb[10].mxu1 %vm313_vm9, %v1358_v59 }
0x1d84   :  { %1747 = vmatpush3.bf16.msra.mxu1 %v1746_v58  ;;  %1588 = vmatprep.mubr.msk.f32.mxu1 %vm1866_vm0, %v1865_v0 }
0x1d85   :  { %1748 = vmatprep.subr.bf16.mxu1 %v1867_v29 }
0x1d88   :  { %1750 = vmatpush3.bf16.msra.mxu1 %v1749_v62 }
0x1e56   :  { %v1427_v1 = vpop.f32.mrb[10].mxu1 }
0x1e57   :  { %v1428_v3 = vadd.f32 %v1427_v1, %v1354_v63  ;;  %v1579_v4 = vpop.f32.mrb[11].mxu1 }
0x1e59   :  { %v1431_v5 = vmax.f32 %v1428_v3, 0.0 }
0x1e5b   :  { %1589 = vmatmul.mubr.msk.f32.vlgmr.msra.gmra.mrb[12].mxu1 %vm313_vm9, %v1431_v5 }
0x1f2e   :  { %v1501_v8 = vpop.f32.mrb[12].mxu1 }
0x1f2f   :  { %v1502_v10 = vadd.f32 %v1501_v8, %v1355_v7  ;;  %v1590_v11 = vpop.f32.mrb[13].mxu1 }
0x1f31   :  { %1506 = vrot.lane.b32.xlu0 %v1502_v10, %s1870_s1 }
0x1fa3   :  { %v1507_v0 = vpop.permute.xlu0 %1506 }
0x1fa4   :  { %v1509_v29 = vsel %vm313_vm9, %v1431_v5, %v1507_v0 }
0x1fa5   :  { %v1511_v13 = vsel %vm1510_vm14, %v1509_v29, 0.0 }
0x1fa6   :  { %1512 = vst [vmem:[#allocation5] sm:$0x1] %v1511_v13 }
0x1fa7   :  { %1847 = shalt.err (!%p1844_p12)
}
0x1fa8   :  { %s1848_s4 = scalar_lea.hbm %s2192_s2, 16 }
0x1fa9   :  { %p1849_p13 = scmp.ne.s32.totalorder %s2192_s2, %s1848_s4  ;;  %p1852_p0 = scmp.lt.u32.totalorder %s1848_s4, %s2192_s2 }
0x1fab   :  { %p1854_p1 = pnand %p1852_p0, %p1849_p13 }
0x1fad   :  { %1857 = shalt.err (!%p1854_p1)
}
0x1fae   :  { %1522 = dma.vmem_to_hbm [thread:$0]  %s1520_s27, 16, %s2192_s2, [#allocation4]  }
0x1faf   :  { %1860 = dma.done.wait [#allocation4], 16  }
0x1fb0   :  { %1861 = vsyncadd [#allocation4], 4294967280 }
0x1fb1   :  { %1526 = vsyncpa [#allocation3], 1 }
0x1fb2   :  { %1527 = vsyncpa [#allocation4], 1 }

</bundles_post_ra>
